<compile_context>
chip_gen: v7x
topology: tpu7x:2x2x1
jax: 0.10.0
libtpu: 0.0.40
codegen_flags: <defaults>
</compile_context>

<pallas_src>
import jax
import jax.numpy as jnp
from jax.experimental import pallas as pl
from jax.experimental.pallas import tpu as pltpu

K = 3
PAD = 1
EPS = 1e-5  # PyTorch BatchNorm2d default eps
VMEM_LIMIT = 32 * 1024 * 1024  # explicit scoped-VMEM budget (safe on v5e/v6e/v7x)
# TODO(synk): raise the VMEM budget / tile targets on v5e/v6e (128 MiB physical) via
# pltpu.get_tpu_info(); keep the conservative 32 MiB budget on v7x (64 MiB physical).


# ----------------------------------------------------------------------------- helpers
def _round_up(x, m):
    return (x + m - 1) // m * m


def _pick_row_tile(H, W, target_rows=1024):
    """Largest divisor TH of H with TH*W <= target_rows and (TH*W) % 8 == 0.

    Falls back to the smallest 8-aligned divisor above the target, then to H.
    """
    best = None
    for th in range(1, H + 1):
        if H % th or (th * W) % 8:
            continue
        if th * W <= target_rows:
            best = th
        else:
            if best is None:
                best = th
            break
    return best if best is not None else H


def _pick_flat_tile(M, target=2048):
    """Largest 8-aligned divisor of M that is <= target (pass-2 row tile)."""
    best = 8
    for t in range(8, min(M, target) + 1, 8):
        if M % t == 0:
            best = t
    return best


# ----------------------------------------------------------------------------- kernels
def _conv_stats_kernel(x_ref, w_ref, y_ref, st_ref):
    """Pass 1: 3x3 conv as 3 MXU matmuls (dy + Cin folded into K) + per-tile centered stats.

    x_ref  : (1, TH, W+2, 3*Cinp) bf16  input rows with the 3 dy shifts stacked along channels
    w_ref  : (3, 3*Cinp, Coutp)   bf16  one (K x Coutp) weight slab per dx tap
    y_ref  : (TH*W, Coutp)        bf16  conv output (pre-BN), row-flattened
    st_ref : (2, Coutp)           f32   [sum, centered sum-of-squares] over this tile's rows
    """
    xt = x_ref[0]                                           # (TH, W+2, 3*Cinp)
    th, wp2, kc = xt.shape
    w_out = wp2 - 2 * PAD
    coutp = w_ref.shape[2]

    acc = jnp.zeros((th * w_out, coutp), jnp.float32)
    for dx in range(K):
        lhs = xt[:, dx:dx + w_out, :].reshape(th * w_out, kc)
        acc = acc + jnp.dot(lhs, w_ref[dx], preferred_element_type=jnp.float32)

    y_ref[...] = acc.astype(y_ref.dtype)

    # Stats from the f32 accumulator (not the bf16-rounded store): sum + centered sum-of-squares.
    s1 = jnp.sum(acc, axis=0, keepdims=True)
    mu = s1 * (1.0 / (th * w_out))
    cen = acc - mu
    s2 = jnp.sum(cen * cen, axis=0, keepdims=True)
    st_ref[...] = jnp.concatenate([s1, s2], axis=0)


def _bn_relu_kernel(y_ref, sc_ref, sh_ref, o_ref):
    """Pass 2: y * scale + shift, then ReLU (scale/shift fold mean/var/gamma/beta)."""
    y = y_ref[...].astype(jnp.float32)
    o_ref[...] = jnp.maximum(y * sc_ref[...] + sh_ref[...], 0.0).astype(o_ref.dtype)


# ----------------------------------------------------------------------------- wrapper
def cbr_forward(x_nchw, w_oihw, bias, gamma, beta, *,
                compute_dtype=jnp.bfloat16, nhwc_out=False):
    """Matches PyTorch CBR(in, out, 3, 1, 1, bias=True, norm='bnorm', relu=0.0) forward."""
    N, Cin, H, W = x_nchw.shape
    Cout = w_oihw.shape[0]
    # TODO(synk): support spatial planes with H*W not a multiple of 8 (needs ragged row tiles).
    assert (H * W) % 8 == 0, "H*W must be a multiple of 8"

    Cinp = _round_up(Cin, 8)      # sublane-aligned per-tap contraction dim
    Coutp = _round_up(Cout, 128)  # lane-dense output channels
    Kc = K * Cinp                 # folded contraction depth (dy, cin)
    M = N * H * W

    TH = _pick_row_tile(H, W)     # rows of output pixels per conv tile ~ TH*W
    Htiles = H // TH
    TM = TH * W
    Wp = W + 2 * PAD

    # --- glue: NCHW -> NHWC, zero-pad channels + spatial halo, fold the 3 dy shifts into channels.
    x_nhwc = jnp.transpose(x_nchw, (0, 2, 3, 1))
    xp = jnp.pad(x_nhwc, ((0, 0), (PAD, PAD), (PAD, PAD), (0, Cinp - Cin)))
    xp = xp.astype(compute_dtype)
    # TODO(synk): replace this dy stack (~3x input HBM traffic) with halo-row fetches of a single
    # padded array (pl.Element offsets or a manual make_async_copy double-buffer).
    xcat = jnp.concatenate([xp[:, dy:dy + H] for dy in range(K)], axis=-1)   # (N, H, Wp, 3*Cinp)

    # Conv weight (Cout, Cin, 3, 3) -> (3 [dx], 3*Cinp [dy, cin], Coutp), zero-padded.
    w_k = jnp.transpose(w_oihw, (2, 3, 1, 0))                                # (dy, dx, Cin, Cout)
    w_k = jnp.pad(w_k, ((0, 0), (0, 0), (0, Cinp - Cin), (0, Coutp - Cout)))
    w_k = jnp.transpose(w_k, (1, 0, 2, 3)).reshape(K, Kc, Coutp).astype(compute_dtype)

    # NOTE: `bias` is intentionally unused — training-mode BatchNorm cancels a per-channel
    # conv bias exactly (it shifts the mean identically and does not change the variance).

    # TODO(synk): single-buffer the constant weight operand (pipeline_mode=pl.Buffered(1)) and,
    # for MXU-bound shapes, 256-align Coutp / use MRB accumulation on v7x.
    cparams1 = pltpu.CompilerParams(
        dimension_semantics=("parallel", "parallel"),
        vmem_limit_bytes=VMEM_LIMIT)
    cost1 = pl.CostEstimate(
        flops=2 * M * (K * K * Cinp) * Coutp,
        transcendentals=0,
        bytes_accessed=(xcat.size * xcat.dtype.itemsize
                        + w_k.size * w_k.dtype.itemsize
                        + M * Coutp * 2 + N * Htiles * 2 * Coutp * 4))

    # ---- Pass 1: conv + per-tile statistics (all grid points independent -> fully parallel).
    y_flat, stats = pl.pallas_call(
        _conv_stats_kernel,
        grid=(N, Htiles),
        in_specs=[
            pl.BlockSpec((1, TH, Wp, Kc), lambda n, i: (n, i, 0, 0)),
            pl.BlockSpec((K, Kc, Coutp), lambda n, i: (0, 0, 0)),
        ],
        out_specs=(
            pl.BlockSpec((TM, Coutp), lambda n, i: (n * Htiles + i, 0)),
            pl.BlockSpec((None, None, 2, Coutp), lambda n, i: (n, i, 0, 0)),
        ),
        out_shape=(
            jax.ShapeDtypeStruct((M, Coutp), compute_dtype),        # bf16 intermediate
            jax.ShapeDtypeStruct((N, Htiles, 2, Coutp), jnp.float32),
        ),
        compiler_params=cparams1,
        cost_estimate=cost1,
    )(xcat, w_k)

    # ---- Tiny XLA glue: per-tile centered stats -> global scale/shift (Chan merge, f32).
    sums = stats[:, :, 0, :]                                         # (N, Htiles, Coutp)
    m2s = stats[:, :, 1, :]                                          # (N, Htiles, Coutp)
    total = jnp.sum(sums, axis=(0, 1))                               # (Coutp,)
    mean = total / M
    mu_t = sums / TM
    m2 = jnp.sum(m2s, axis=(0, 1)) + TM * jnp.sum((mu_t - mean) ** 2, axis=(0, 1))
    var = jnp.maximum(m2 / M, 0.0)                                   # biased variance (train mode)

    gamma_p = jnp.pad(gamma.astype(jnp.float32), (0, Coutp - Cout))
    beta_p = jnp.pad(beta.astype(jnp.float32), (0, Coutp - Cout))
    g_inv = gamma_p * jax.lax.rsqrt(var + EPS)
    scale = g_inv.reshape(1, Coutp)
    shift = (beta_p - mean * g_inv).reshape(1, Coutp)

    # ---- Pass 2: normalize + ReLU (memory-bound, lane-dense, large independent tiles).
    TM2 = _pick_flat_tile(M)
    cparams2 = pltpu.CompilerParams(
        dimension_semantics=("parallel",),
        vmem_limit_bytes=VMEM_LIMIT)
    out_flat = pl.pallas_call(
        _bn_relu_kernel,
        grid=(M // TM2,),
        in_specs=[
            pl.BlockSpec((TM2, Coutp), lambda i: (i, 0)),
            pl.BlockSpec((1, Coutp), lambda i: (0, 0)),
            pl.BlockSpec((1, Coutp), lambda i: (0, 0)),
        ],
        out_specs=pl.BlockSpec((TM2, Coutp), lambda i: (i, 0)),
        out_shape=jax.ShapeDtypeStruct((M, Coutp), jnp.float32),
        compiler_params=cparams2,
    )(y_flat, scale, shift)

    # Slice the valid channels first so the layout glue only touches Cout (not Coutp).
    out_nhwc = out_flat[:, :Cout].reshape(N, H, W, Cout)
    if nhwc_out:
        return out_nhwc
    return jnp.transpose(out_nhwc, (0, 3, 1, 2))


# ----------------------------------------------------------------------------- reference
def _reference(x_nchw, w_oihw, bias, gamma, beta):
    """Pure-JAX f32 reference (conv + bias + train-mode BN + ReLU)."""
    y = jax.lax.conv_general_dilated(
        x_nchw, w_oihw, window_strides=(1, 1), padding=((PAD, PAD), (PAD, PAD)),
        dimension_numbers=("NCHW", "OIHW", "NCHW"),
        precision=jax.lax.Precision.HIGHEST)
    y = y + bias.reshape(1, -1, 1, 1)
    mean = jnp.mean(y, axis=(0, 2, 3), keepdims=True)
    var = jnp.mean((y - mean) ** 2, axis=(0, 2, 3), keepdims=True)
    y = (y - mean) * jax.lax.rsqrt(var + EPS)
    y = y * gamma.reshape(1, -1, 1, 1) + beta.reshape(1, -1, 1, 1)
    return jnp.maximum(y, 0.0)


if __name__ == "__main__":
    N, Cin, Cout, H, W = 2, 4, 8, 16, 16

    key = jax.random.PRNGKey(0)
    kx, kw, kb, kg, kbe = jax.random.split(key, 5)
    x = jax.random.normal(kx, (N, Cin, H, W), dtype=jnp.float32)
    w = jax.random.normal(kw, (Cout, Cin, K, K), dtype=jnp.float32) * 0.1
    b = jax.random.normal(kb, (Cout,), dtype=jnp.float32) * 0.1
    gamma = 1.0 + 0.1 * jax.random.normal(kg, (Cout,), dtype=jnp.float32)
    beta = 0.1 * jax.random.normal(kbe, (Cout,), dtype=jnp.float32)

    fwd = jax.jit(cbr_forward)
    out = jax.block_until_ready(fwd(x, w, b, gamma, beta))
    assert out.shape == (N, Cout, H, W)

    # Tight-ish check: reference fed the same bf16-rounded conv operands; the residual difference
    # is the bf16 rounding of the pre-BN intermediate (stats themselves are taken in f32).
    xq = x.astype(jnp.bfloat16).astype(jnp.float32)
    wq = w.astype(jnp.bfloat16).astype(jnp.float32)
    ref_q = jax.block_until_ready(_reference(xq, wq, b, gamma, beta))
    assert jnp.allclose(out, ref_q, rtol=1e-2, atol=1e-2), "mismatch vs quantized-input reference"

    # Loose check vs full-f32 reference (adds bf16 rounding of the matmul operands).
    ref = jax.block_until_ready(_reference(x, w, b, gamma, beta))
    assert jnp.allclose(out, ref, rtol=3e-2, atol=3e-2), "mismatch vs f32 reference"

    print("KERNEL_OK")
</pallas_src>

<mosaic_0001>
module attributes {stable_mosaic.version = 11 : i64} {
  func.func @_conv_stats_kernel(%arg0: i32, %arg1: i32, %arg2: memref<1x16x18x24xbf16, #tpu.memory_space<vmem>>, %arg3: memref<3x24x128xbf16, #tpu.memory_space<vmem>>, %arg4: memref<256x128xbf16, #tpu.memory_space<vmem>>, %arg5: memref<1x1x2x128xf32, #tpu.memory_space<vmem>>) attributes {dimension_semantics = [#tpu.dimension_semantics<parallel>, #tpu.dimension_semantics<parallel>], iteration_bounds = array<i64: 2, 1>, scalar_prefetch = 0 : i64, scratch_operands = 0 : i64, tpu.core_type = #tpu.core_type<tc>, window_params = [{transform_indices = @transform_0, window_bounds = array<i64: 1, 16, 18, 24>}, {pipeline_mode = #tpu.pipeline_mode<synchronous>, transform_indices = @transform_1, window_bounds = array<i64: 3, 24, 128>}, {transform_indices = @transform_2, window_bounds = array<i64: 256, 128>}, {transform_indices = @transform_3, window_bounds = array<i64: 1, 1, 2, 128>}]} {
    %c0 = arith.constant 0 : index
    %c0_0 = arith.constant 0 : index
    %c0_1 = arith.constant 0 : index
    %c0_2 = arith.constant 0 : index
    %0 = vector.load %arg2[%c0, %c0_0, %c0_1, %c0_2] : memref<1x16x18x24xbf16, #tpu.memory_space<vmem>>, vector<1x16x18x24xbf16>
    %1 = vector.shape_cast %0 : vector<1x16x18x24xbf16> to vector<16x18x24xbf16>
    %cst = arith.constant 0.000000e+00 : f32
    %2 = vector.broadcast %cst : f32 to vector<256x128xf32>
    %3 = vector.extract_strided_slice %1 {offsets = [0, 0, 0], sizes = [16, 16, 24], strides = [1, 1, 1]} : vector<16x18x24xbf16> to vector<16x16x24xbf16>
    %4 = vector.shape_cast %3 : vector<16x16x24xbf16> to vector<256x24xbf16>
    %c0_3 = arith.constant 0 : index
    %c0_4 = arith.constant 0 : index
    %c0_5 = arith.constant 0 : index
    %5 = vector.load %arg3[%c0_3, %c0_4, %c0_5] : memref<3x24x128xbf16, #tpu.memory_space<vmem>>, vector<1x24x128xbf16>
    %6 = vector.shape_cast %5 : vector<1x24x128xbf16> to vector<24x128xbf16>
    %cst_6 = arith.constant dense<0.000000e+00> : vector<256x128xf32>
    %7 = tpu.matmul %4, %6, %cst_6 {dimension_numbers = #tpu.dot_dimension_numbers<[1], [0], [0], [1], [0, 0, 1, 1], [], []>} : vector<256x24xbf16>, vector<24x128xbf16>, vector<256x128xf32> -> vector<256x128xf32>
    %8 = arith.addf %2, %7 : vector<256x128xf32>
    %9 = vector.extract_strided_slice %1 {offsets = [0, 1, 0], sizes = [16, 16, 24], strides = [1, 1, 1]} : vector<16x18x24xbf16> to vector<16x16x24xbf16>
    %10 = vector.shape_cast %9 : vector<16x16x24xbf16> to vector<256x24xbf16>
    %c1 = arith.constant 1 : index
    %c0_7 = arith.constant 0 : index
    %c0_8 = arith.constant 0 : index
    %11 = vector.load %arg3[%c1, %c0_7, %c0_8] : memref<3x24x128xbf16, #tpu.memory_space<vmem>>, vector<1x24x128xbf16>
    %12 = vector.shape_cast %11 : vector<1x24x128xbf16> to vector<24x128xbf16>
    %cst_9 = arith.constant dense<0.000000e+00> : vector<256x128xf32>
    %13 = tpu.matmul %10, %12, %cst_9 {dimension_numbers = #tpu.dot_dimension_numbers<[1], [0], [0], [1], [0, 0, 1, 1], [], []>} : vector<256x24xbf16>, vector<24x128xbf16>, vector<256x128xf32> -> vector<256x128xf32>
    %14 = arith.addf %8, %13 : vector<256x128xf32>
    %15 = vector.extract_strided_slice %1 {offsets = [0, 2, 0], sizes = [16, 16, 24], strides = [1, 1, 1]} : vector<16x18x24xbf16> to vector<16x16x24xbf16>
    %16 = vector.shape_cast %15 : vector<16x16x24xbf16> to vector<256x24xbf16>
    %c2 = arith.constant 2 : index
    %c0_10 = arith.constant 0 : index
    %c0_11 = arith.constant 0 : index
    %17 = vector.load %arg3[%c2, %c0_10, %c0_11] : memref<3x24x128xbf16, #tpu.memory_space<vmem>>, vector<1x24x128xbf16>
    %18 = vector.shape_cast %17 : vector<1x24x128xbf16> to vector<24x128xbf16>
    %cst_12 = arith.constant dense<0.000000e+00> : vector<256x128xf32>
    %19 = tpu.matmul %16, %18, %cst_12 {dimension_numbers = #tpu.dot_dimension_numbers<[1], [0], [0], [1], [0, 0, 1, 1], [], []>} : vector<256x24xbf16>, vector<24x128xbf16>, vector<256x128xf32> -> vector<256x128xf32>
    %20 = arith.addf %14, %19 : vector<256x128xf32>
    %21 = arith.truncf %20 : vector<256x128xf32> to vector<256x128xbf16>
    %c0_13 = arith.constant 0 : index
    %c0_14 = arith.constant 0 : index
    %22 = vector.load %arg4[%c0_13, %c0_14] : memref<256x128xbf16, #tpu.memory_space<vmem>>, vector<256x128xbf16>
    tpu.vector_store %arg4[%c0_13, %c0_14], %21 {strides = array<i32>} : memref<256x128xbf16, #tpu.memory_space<vmem>>, vector<256x128xbf16>,
    %cst_15 = arith.constant dense<0.000000e+00> : vector<128xf32>
    %23 = vector.multi_reduction <add>, %20, %cst_15 [0] : vector<256x128xf32> to vector<128xf32>
    %24 = vector.shape_cast %23 : vector<128xf32> to vector<1x128xf32>
    %cst_16 = arith.constant 3.906250e-03 : f32
    %25 = vector.broadcast %cst_16 : f32 to vector<1x128xf32>
    %26 = arith.mulf %24, %25 : vector<1x128xf32>
    %27 = vector.broadcast %26 : vector<1x128xf32> to vector<256x128xf32>
    %28 = arith.subf %20, %27 : vector<256x128xf32>
    %29 = arith.mulf %28, %28 : vector<256x128xf32>
    %cst_17 = arith.constant dense<0.000000e+00> : vector<128xf32>
    %30 = vector.multi_reduction <add>, %29, %cst_17 [0] : vector<256x128xf32> to vector<128xf32>
    %31 = vector.shape_cast %30 : vector<128xf32> to vector<1x128xf32>
    %32 = tpu.concatenate %24, %31 in 0 : vector<1x128xf32>, vector<1x128xf32> -> vector<2x128xf32>
    %c0_18 = arith.constant 0 : index
    %c0_19 = arith.constant 0 : index
    %c0_20 = arith.constant 0 : index
    %c0_21 = arith.constant 0 : index
    %33 = vector.load %arg5[%c0_18, %c0_19, %c0_20, %c0_21] : memref<1x1x2x128xf32, #tpu.memory_space<vmem>>, vector<1x1x2x128xf32>
    %34 = vector.shape_cast %33 : vector<1x1x2x128xf32> to vector<2x128xf32>
    %35 = vector.shape_cast %32 : vector<2x128xf32> to vector<1x1x2x128xf32>
    tpu.vector_store %arg5[%c0_18, %c0_19, %c0_20, %c0_21], %35 {strides = array<i32>} : memref<1x1x2x128xf32, #tpu.memory_space<vmem>>, vector<1x1x2x128xf32>,
    return
  }
  func.func @transform_0(%arg0: i32, %arg1: i32) -> (i32, i32, i32, i32) {
    %c0_i32 = arith.constant 0 : i32
    %c0_i32_0 = arith.constant 0 : i32
    %c0_i32_1 = arith.constant 0 : i32
    return %arg0, %arg1, %c0_i32, %c0_i32_0 : i32, i32, i32, i32
  }
  func.func @transform_1(%arg0: i32, %arg1: i32) -> (i32, i32, i32) {
    %c0_i32 = arith.constant 0 : i32
    %c0_i32_0 = arith.constant 0 : i32
    %c0_i32_1 = arith.constant 0 : i32
    %c0_i32_2 = arith.constant 0 : i32
    return %c0_i32, %c0_i32_0, %c0_i32_1 : i32, i32, i32
  }
  func.func @transform_2(%arg0: i32, %arg1: i32) -> (i32, i32) {
    %c1_i32 = arith.constant 1 : i32
    %0 = arith.muli %arg0, %c1_i32 : i32
    %1 = arith.addi %0, %arg1 : i32
    %c0_i32 = arith.constant 0 : i32
    %c0_i32_0 = arith.constant 0 : i32
    return %1, %c0_i32 : i32, i32
  }
  func.func @transform_3(%arg0: i32, %arg1: i32) -> (i32, i32, i32, i32) {
    %c0_i32 = arith.constant 0 : i32
    %c0_i32_0 = arith.constant 0 : i32
    %c0_i32_1 = arith.constant 0 : i32
    return %arg0, %arg1, %c0_i32, %c0_i32_0 : i32, i32, i32, i32
  }
}

module attributes {stable_mosaic.version = 11 : i64} {
  func.func @_bn_relu_kernel(%arg0: i32, %arg1: memref<512x128xbf16, #tpu.memory_space<vmem>>, %arg2: memref<1x128xf32, #tpu.memory_space<vmem>>, %arg3: memref<1x128xf32, #tpu.memory_space<vmem>>, %arg4: memref<512x128xf32, #tpu.memory_space<vmem>>) attributes {dimension_semantics = [#tpu.dimension_semantics<parallel>], iteration_bounds = array<i64: 1>, scalar_prefetch = 0 : i64, scratch_operands = 0 : i64, tpu.core_type = #tpu.core_type<tc>, window_params = [{transform_indices = @transform_0, window_bounds = array<i64: 512, 128>}, {pipeline_mode = #tpu.pipeline_mode<synchronous>, transform_indices = @transform_1, window_bounds = array<i64: 1, 128>}, {pipeline_mode = #tpu.pipeline_mode<synchronous>, transform_indices = @transform_2, window_bounds = array<i64: 1, 128>}, {transform_indices = @transform_3, window_bounds = array<i64: 512, 128>}]} {
    %c0 = arith.constant 0 : index
    %c0_0 = arith.constant 0 : index
    %0 = vector.load %arg1[%c0, %c0_0] : memref<512x128xbf16, #tpu.memory_space<vmem>>, vector<512x128xbf16>
    %1 = arith.extf %0 : vector<512x128xbf16> to vector<512x128xf32>
    %c0_1 = arith.constant 0 : index
    %c0_2 = arith.constant 0 : index
    %2 = vector.load %arg2[%c0_1, %c0_2] : memref<1x128xf32, #tpu.memory_space<vmem>>, vector<1x128xf32>
    %3 = vector.broadcast %2 : vector<1x128xf32> to vector<512x128xf32>
    %4 = arith.mulf %1, %3 : vector<512x128xf32>
    %c0_3 = arith.constant 0 : index
    %c0_4 = arith.constant 0 : index
    %5 = vector.load %arg3[%c0_3, %c0_4] : memref<1x128xf32, #tpu.memory_space<vmem>>, vector<1x128xf32>
    %6 = vector.broadcast %5 : vector<1x128xf32> to vector<512x128xf32>
    %7 = arith.addf %4, %6 : vector<512x128xf32>
    %cst = arith.constant 0.000000e+00 : f32
    %8 = vector.broadcast %cst : f32 to vector<512x128xf32>
    %9 = arith.maximumf %7, %8 : vector<512x128xf32>
    %c0_5 = arith.constant 0 : index
    %c0_6 = arith.constant 0 : index
    %10 = vector.load %arg4[%c0_5, %c0_6] : memref<512x128xf32, #tpu.memory_space<vmem>>, vector<512x128xf32>
    tpu.vector_store %arg4[%c0_5, %c0_6], %9 {strides = array<i32>} : memref<512x128xf32, #tpu.memory_space<vmem>>, vector<512x128xf32>,
    return
  }
  func.func @transform_0(%arg0: i32) -> (i32, i32) {
    %c0_i32 = arith.constant 0 : i32
    %c0_i32_0 = arith.constant 0 : i32
    return %arg0, %c0_i32 : i32, i32
  }
  func.func @transform_1(%arg0: i32) -> (i32, i32) {
    %c0_i32 = arith.constant 0 : i32
    %c0_i32_0 = arith.constant 0 : i32
    %c0_i32_1 = arith.constant 0 : i32
    return %c0_i32, %c0_i32_0 : i32, i32
  }
  func.func @transform_2(%arg0: i32) -> (i32, i32) {
    %c0_i32 = arith.constant 0 : i32
    %c0_i32_0 = arith.constant 0 : i32
    %c0_i32_1 = arith.constant 0 : i32
    return %c0_i32, %c0_i32_0 : i32, i32
  }
  func.func @transform_3(%arg0: i32) -> (i32, i32) {
    %c0_i32 = arith.constant 0 : i32
    %c0_i32_0 = arith.constant 0 : i32
    return %arg0, %c0_i32 : i32, i32
  }
}

</mosaic_0001>

<bundles_post_ra>
// kernel: cbr_forward.3
= control target key start
LH: loop header
LB: loop body
LE: loop exit
PB: predicated region body
PF: predicated region fallthrough
CT: control target
= control target key end

     0   :  { %s1023_s0 = inlined_call_operand.vmem [shape: bf16[512,128], index: 0, kind: input, shape index: {}]   ;;  %s1024_s1 = inlined_call_operand.vmem [shape: f32[1,128], index: 1, kind: input, shape index: {}]   ;;  %s1025_s2 = inlined_call_operand.vmem [shape: f32[1,128], index: 2, kind: input, shape index: {}]   ;;  %s1026_s3 = inlined_call_operand.vmem [shape: f32[512,128], index: 3, kind: output, shape index: {}]  }
   0x1   :  { %v419_v0 = vld [vmem:[%s1023_s0] sm:$0xff]   ;;  %v546_v4 = vld [vmem:[%s1023_s0 + $0x8] sm:$0xff]   ;;  %v547_v5 = vld [vmem:[%s1023_s0 + $0x10] sm:$0xff]  }
   0x2   :  { %v603_v1 = vld [vmem:[%s1024_s1] ss:$0 sm:$0xff]  ;;  %v420_v2 = vunpack.c.l.bf16 %v419_v0  ;;  %v421_v3 = vunpack.c.h.bf16 %v419_v0  ;;  %v548_v6 = vld [vmem:[%s1023_s0 + $0x18] sm:$0xff]   ;;  %v424_v8 = vunpack.c.l.bf16 %v546_v4  ;;  %v425_v9 = vunpack.c.h.bf16 %v546_v4  ;;  %v550_v33 = vld [vmem:[%s1023_s0 + $0x28] sm:$0xff]  }
   0x3   :  { %v617_v7 = vld [vmem:[%s1025_s2] ss:$0 sm:$0xff]  ;;  %v428_v10 = vunpack.c.l.bf16 %v547_v5  ;;  %v429_v11 = vunpack.c.h.bf16 %v547_v5  ;;  %v432_v14 = vunpack.c.l.bf16 %v548_v6  ;;  %v433_v15 = vunpack.c.h.bf16 %v548_v6  ;;  %v551_v34 = vld [vmem:[%s1023_s0 + $0x30] sm:$0xff]   ;;  %v552_v39 = vld [vmem:[%s1023_s0 + $0x38] sm:$0xff]  }
   0x4   :  { %v149_v12 = vmul.f32 %v420_v2, %v603_v1  ;;  %v150_v13 = vmul.f32 %v421_v3, %v603_v1  ;;  %v151_v16 = vmul.f32 %v424_v8, %v603_v1  ;;  %v152_v17 = vmul.f32 %v425_v9, %v603_v1  ;;  %v549_v28 = vld [vmem:[%s1023_s0 + $0x20] sm:$0xff]   ;;  %v554_v6 = vld [vmem:[%s1023_s0 + $0x48] sm:$0xff]   ;;  %v555_v8 = vld [vmem:[%s1023_s0 + $0x50] sm:$0xff]  }
   0x5   :  { %v153_v18 = vmul.f32 %v428_v10, %v603_v1  ;;  %v154_v19 = vmul.f32 %v429_v11, %v603_v1  ;;  %v155_v22 = vmul.f32 %v432_v14, %v603_v1  ;;  %v156_v23 = vmul.f32 %v433_v15, %v603_v1  ;;  %v553_v0 = vld [vmem:[%s1023_s0 + $0x40] sm:$0xff]  }
   0x6   :  { %v220_v20 = vadd.f32 %v617_v7, %v149_v12  ;;  %v221_v21 = vadd.f32 %v617_v7, %v150_v13  ;;  %v222_v24 = vadd.f32 %v617_v7, %v151_v16  ;;  %v223_v25 = vadd.f32 %v617_v7, %v152_v17  ;;  %v556_v13 = vld [vmem:[%s1023_s0 + $0x58] sm:$0xff]  }
   0x7   :  { %v224_v26 = vadd.f32 %v617_v7, %v153_v18  ;;  %v225_v27 = vadd.f32 %v617_v7, %v154_v19  ;;  %v226_v31 = vadd.f32 %v617_v7, %v155_v22  ;;  %v227_v32 = vadd.f32 %v617_v7, %v156_v23 }
   0x8   :  { %v284_v29 = vmax.f32 %v220_v20, 0.0  ;;  %v285_v30 = vmax.f32 %v221_v21, 0.0  ;;  %v286_v35 = vmax.f32 %v222_v24, 0.0  ;;  %v287_v36 = vmax.f32 %v223_v25, 0.0 }
   0x9   :  { %v288_v37 = vmax.f32 %v224_v26, 0.0  ;;  %v289_v38 = vmax.f32 %v225_v27, 0.0  ;;  %v290_v40 = vmax.f32 %v226_v31, 0.0  ;;  %v291_v41 = vmax.f32 %v227_v32, 0.0 }
   0xa   :  { %348 = vst [vmem:[%s1026_s3] sm:$0xff] %v284_v29  ;;  %349 = vst [vmem:[%s1026_s3 + $0x8] sm:$0xff] %v285_v30  ;;  %v436_v42 = vunpack.c.l.bf16 %v549_v28  ;;  %v437_v43 = vunpack.c.h.bf16 %v549_v28  ;;  %v440_v44 = vunpack.c.l.bf16 %v550_v33  ;;  %v441_v45 = vunpack.c.h.bf16 %v550_v33 }
   0xb   :  { %350 = vst [vmem:[%s1026_s3 + $0x10] sm:$0xff] %v286_v35  ;;  %351 = vst [vmem:[%s1026_s3 + $0x18] sm:$0xff] %v287_v36  ;;  %v444_v46 = vunpack.c.l.bf16 %v551_v34  ;;  %v445_v47 = vunpack.c.h.bf16 %v551_v34  ;;  %v448_v50 = vunpack.c.l.bf16 %v552_v39  ;;  %v449_v51 = vunpack.c.h.bf16 %v552_v39 }
   0xc   :  { %352 = vst [vmem:[%s1026_s3 + $0x20] sm:$0xff] %v288_v37  ;;  %353 = vst [vmem:[%s1026_s3 + $0x28] sm:$0xff] %v289_v38  ;;  %v157_v48 = vmul.f32 %v436_v42, %v603_v1  ;;  %v158_v49 = vmul.f32 %v437_v43, %v603_v1  ;;  %v159_v52 = vmul.f32 %v440_v44, %v603_v1  ;;  %v452_v16 = vunpack.c.l.bf16 %v553_v0  ;;  %v557_v38 = vld [vmem:[%s1023_s0 + $0x60] sm:$0xff]   ;;  %v558_v43 = vld [vmem:[%s1023_s0 + $0x68] sm:$0xff]  }
   0xd   :  { %354 = vst [vmem:[%s1026_s3 + $0x30] sm:$0xff] %v290_v40  ;;  %355 = vst [vmem:[%s1026_s3 + $0x38] sm:$0xff] %v291_v41  ;;  %v160_v53 = vmul.f32 %v441_v45, %v603_v1  ;;  %v161_v54 = vmul.f32 %v444_v46, %v603_v1  ;;  %v162_v55 = vmul.f32 %v445_v47, %v603_v1  ;;  %v453_v17 = vunpack.c.h.bf16 %v553_v0  ;;  %v559_v44 = vld [vmem:[%s1023_s0 + $0x70] sm:$0xff]  }
   0xe   :  { %v228_v56 = vadd.f32 %v617_v7, %v157_v48  ;;  %v229_v57 = vadd.f32 %v617_v7, %v158_v49  ;;  %v163_v58 = vmul.f32 %v448_v50, %v603_v1  ;;  %v164_v59 = vmul.f32 %v449_v51, %v603_v1  ;;  %v560_v49 = vld [vmem:[%s1023_s0 + $0x78] sm:$0xff]  }
   0xf   :  { %v230_v60 = vadd.f32 %v617_v7, %v159_v52  ;;  %v231_v61 = vadd.f32 %v617_v7, %v160_v53  ;;  %v232_v62 = vadd.f32 %v617_v7, %v161_v54  ;;  %v233_v63 = vadd.f32 %v617_v7, %v162_v55 }
  0x10   :  { %v292_v2 = vmax.f32 %v228_v56, 0.0  ;;  %v293_v3 = vmax.f32 %v229_v57, 0.0  ;;  %v234_v4 = vadd.f32 %v617_v7, %v163_v58  ;;  %v235_v5 = vadd.f32 %v617_v7, %v164_v59 }
  0x11   :  { %v294_v9 = vmax.f32 %v230_v60, 0.0  ;;  %v295_v10 = vmax.f32 %v231_v61, 0.0  ;;  %v296_v11 = vmax.f32 %v232_v62, 0.0  ;;  %v297_v12 = vmax.f32 %v233_v63, 0.0 }
  0x12   :  { %356 = vst [vmem:[%s1026_s3 + $0x40] sm:$0xff] %v292_v2  ;;  %357 = vst [vmem:[%s1026_s3 + $0x48] sm:$0xff] %v293_v3  ;;  %v298_v14 = vmax.f32 %v234_v4, 0.0  ;;  %v299_v15 = vmax.f32 %v235_v5, 0.0  ;;  %v456_v18 = vunpack.c.l.bf16 %v554_v6  ;;  %v457_v19 = vunpack.c.h.bf16 %v554_v6 }
  0x13   :  { %358 = vst [vmem:[%s1026_s3 + $0x50] sm:$0xff] %v294_v9  ;;  %359 = vst [vmem:[%s1026_s3 + $0x58] sm:$0xff] %v295_v10  ;;  %v460_v20 = vunpack.c.l.bf16 %v555_v8  ;;  %v461_v21 = vunpack.c.h.bf16 %v555_v8  ;;  %v165_v22 = vmul.f32 %v452_v16, %v603_v1  ;;  %v166_v23 = vmul.f32 %v453_v17, %v603_v1  ;;  %v562_v17 = vld [vmem:[%s1023_s0 + $0x88] sm:$0xff]  }
  0x14   :  { %360 = vst [vmem:[%s1026_s3 + $0x60] sm:$0xff] %v296_v11  ;;  %361 = vst [vmem:[%s1026_s3 + $0x68] sm:$0xff] %v297_v12  ;;  %v464_v24 = vunpack.c.l.bf16 %v556_v13  ;;  %v465_v25 = vunpack.c.h.bf16 %v556_v13  ;;  %v167_v26 = vmul.f32 %v456_v18, %v603_v1  ;;  %v168_v27 = vmul.f32 %v457_v19, %v603_v1  ;;  %v561_v12 = vld [vmem:[%s1023_s0 + $0x80] sm:$0xff]   ;;  %v563_v18 = vld [vmem:[%s1023_s0 + $0x90] sm:$0xff]  }
  0x15   :  { %362 = vst [vmem:[%s1026_s3 + $0x70] sm:$0xff] %v298_v14  ;;  %363 = vst [vmem:[%s1026_s3 + $0x78] sm:$0xff] %v299_v15  ;;  %v169_v28 = vmul.f32 %v460_v20, %v603_v1  ;;  %v170_v29 = vmul.f32 %v461_v21, %v603_v1  ;;  %v236_v30 = vadd.f32 %v617_v7, %v165_v22  ;;  %v468_v52 = vunpack.c.l.bf16 %v557_v38 }
  0x16   :  { %v237_v31 = vadd.f32 %v617_v7, %v166_v23  ;;  %v171_v32 = vmul.f32 %v464_v24, %v603_v1  ;;  %v172_v33 = vmul.f32 %v465_v25, %v603_v1  ;;  %v238_v34 = vadd.f32 %v617_v7, %v167_v26  ;;  %v564_v23 = vld [vmem:[%s1023_s0 + $0x98] sm:$0xff]  }
  0x17   :  { %v239_v35 = vadd.f32 %v617_v7, %v168_v27  ;;  %v240_v36 = vadd.f32 %v617_v7, %v169_v28  ;;  %v241_v37 = vadd.f32 %v617_v7, %v170_v29  ;;  %v300_v39 = vmax.f32 %v236_v30, 0.0 }
  0x18   :  { %v301_v40 = vmax.f32 %v237_v31, 0.0  ;;  %v242_v41 = vadd.f32 %v617_v7, %v171_v32  ;;  %v243_v42 = vadd.f32 %v617_v7, %v172_v33  ;;  %v302_v45 = vmax.f32 %v238_v34, 0.0 }
  0x19   :  { %v303_v46 = vmax.f32 %v239_v35, 0.0  ;;  %v304_v47 = vmax.f32 %v240_v36, 0.0  ;;  %v305_v48 = vmax.f32 %v241_v37, 0.0  ;;  %364 = vst [vmem:[%s1026_s3 + $0x80] sm:$0xff] %v300_v39  ;;  %v469_v53 = vunpack.c.h.bf16 %v557_v38 }
  0x1a   :  { %365 = vst [vmem:[%s1026_s3 + $0x88] sm:$0xff] %v301_v40  ;;  %v306_v50 = vmax.f32 %v242_v41, 0.0  ;;  %v307_v51 = vmax.f32 %v243_v42, 0.0  ;;  %366 = vst [vmem:[%s1026_s3 + $0x90] sm:$0xff] %v302_v45  ;;  %v472_v54 = vunpack.c.l.bf16 %v558_v43  ;;  %v473_v55 = vunpack.c.h.bf16 %v558_v43 }
  0x1b   :  { %367 = vst [vmem:[%s1026_s3 + $0x98] sm:$0xff] %v303_v46  ;;  %368 = vst [vmem:[%s1026_s3 + $0xa0] sm:$0xff] %v304_v47  ;;  %v476_v56 = vunpack.c.l.bf16 %v559_v44  ;;  %v477_v57 = vunpack.c.h.bf16 %v559_v44  ;;  %v173_v58 = vmul.f32 %v468_v52, %v603_v1  ;;  %v174_v59 = vmul.f32 %v469_v53, %v603_v1  ;;  %v566_v53 = vld [vmem:[%s1023_s0 + $0xa8] sm:$0xff]  }
  0x1c   :  { %369 = vst [vmem:[%s1026_s3 + $0xa8] sm:$0xff] %v305_v48  ;;  %370 = vst [vmem:[%s1026_s3 + $0xb0] sm:$0xff] %v306_v50  ;;  %v480_v60 = vunpack.c.l.bf16 %v560_v49  ;;  %v481_v61 = vunpack.c.h.bf16 %v560_v49  ;;  %v175_v62 = vmul.f32 %v472_v54, %v603_v1  ;;  %v176_v63 = vmul.f32 %v473_v55, %v603_v1  ;;  %v565_v48 = vld [vmem:[%s1023_s0 + $0xa0] sm:$0xff]   ;;  %v567_v54 = vld [vmem:[%s1023_s0 + $0xb0] sm:$0xff]  }
  0x1d   :  { %371 = vst [vmem:[%s1026_s3 + $0xb8] sm:$0xff] %v307_v51  ;;  %v177_v0 = vmul.f32 %v476_v56, %v603_v1  ;;  %v178_v2 = vmul.f32 %v477_v57, %v603_v1  ;;  %v244_v3 = vadd.f32 %v617_v7, %v173_v58  ;;  %v245_v4 = vadd.f32 %v617_v7, %v174_v59  ;;  %v568_v59 = vld [vmem:[%s1023_s0 + $0xb8] sm:$0xff]  }
  0x1e   :  { %v179_v5 = vmul.f32 %v480_v60, %v603_v1  ;;  %v180_v6 = vmul.f32 %v481_v61, %v603_v1  ;;  %v246_v8 = vadd.f32 %v617_v7, %v175_v62  ;;  %v247_v9 = vadd.f32 %v617_v7, %v176_v63 }
  0x1f   :  { %v248_v10 = vadd.f32 %v617_v7, %v177_v0  ;;  %v249_v11 = vadd.f32 %v617_v7, %v178_v2  ;;  %v308_v13 = vmax.f32 %v244_v3, 0.0  ;;  %v309_v14 = vmax.f32 %v245_v4, 0.0 }
  0x20   :  { %v250_v15 = vadd.f32 %v617_v7, %v179_v5  ;;  %v251_v16 = vadd.f32 %v617_v7, %v180_v6  ;;  %v310_v19 = vmax.f32 %v246_v8, 0.0  ;;  %v311_v20 = vmax.f32 %v247_v9, 0.0 }
  0x21   :  { %v312_v21 = vmax.f32 %v248_v10, 0.0  ;;  %v313_v22 = vmax.f32 %v249_v11, 0.0  ;;  %372 = vst [vmem:[%s1026_s3 + $0xc0] sm:$0xff] %v308_v13  ;;  %373 = vst [vmem:[%s1026_s3 + $0xc8] sm:$0xff] %v309_v14  ;;  %v484_v26 = vunpack.c.l.bf16 %v561_v12  ;;  %v485_v27 = vunpack.c.h.bf16 %v561_v12 }
  0x22   :  { %v314_v24 = vmax.f32 %v250_v15, 0.0  ;;  %v315_v25 = vmax.f32 %v251_v16, 0.0  ;;  %374 = vst [vmem:[%s1026_s3 + $0xd0] sm:$0xff] %v310_v19  ;;  %375 = vst [vmem:[%s1026_s3 + $0xd8] sm:$0xff] %v311_v20  ;;  %v488_v28 = vunpack.c.l.bf16 %v562_v17  ;;  %v489_v29 = vunpack.c.h.bf16 %v562_v17 }
  0x23   :  { %376 = vst [vmem:[%s1026_s3 + $0xe0] sm:$0xff] %v312_v21  ;;  %377 = vst [vmem:[%s1026_s3 + $0xe8] sm:$0xff] %v313_v22  ;;  %v492_v30 = vunpack.c.l.bf16 %v563_v18  ;;  %v493_v31 = vunpack.c.h.bf16 %v563_v18  ;;  %v181_v32 = vmul.f32 %v484_v26, %v603_v1  ;;  %v182_v33 = vmul.f32 %v485_v27, %v603_v1  ;;  %v569_v22 = vld [vmem:[%s1023_s0 + $0xc0] sm:$0xff]   ;;  %v570_v27 = vld [vmem:[%s1023_s0 + $0xc8] sm:$0xff]  }
  0x24   :  { %378 = vst [vmem:[%s1026_s3 + $0xf0] sm:$0xff] %v314_v24  ;;  %379 = vst [vmem:[%s1026_s3 + $0xf8] sm:$0xff] %v315_v25  ;;  %v496_v34 = vunpack.c.l.bf16 %v564_v23  ;;  %v497_v35 = vunpack.c.h.bf16 %v564_v23  ;;  %v183_v36 = vmul.f32 %v488_v28, %v603_v1  ;;  %v184_v37 = vmul.f32 %v489_v29, %v603_v1  ;;  %v571_v28 = vld [vmem:[%s1023_s0 + $0xd0] sm:$0xff]  }
  0x25   :  { %v185_v38 = vmul.f32 %v492_v30, %v603_v1  ;;  %v186_v39 = vmul.f32 %v493_v31, %v603_v1  ;;  %v252_v40 = vadd.f32 %v617_v7, %v181_v32  ;;  %v253_v41 = vadd.f32 %v617_v7, %v182_v33  ;;  %v572_v33 = vld [vmem:[%s1023_s0 + $0xd8] sm:$0xff]  }
  0x26   :  { %v187_v42 = vmul.f32 %v496_v34, %v603_v1  ;;  %v188_v43 = vmul.f32 %v497_v35, %v603_v1  ;;  %v254_v44 = vadd.f32 %v617_v7, %v183_v36  ;;  %v255_v45 = vadd.f32 %v617_v7, %v184_v37 }
  0x27   :  { %v256_v46 = vadd.f32 %v617_v7, %v185_v38  ;;  %v257_v47 = vadd.f32 %v617_v7, %v186_v39  ;;  %v316_v49 = vmax.f32 %v252_v40, 0.0  ;;  %v317_v50 = vmax.f32 %v253_v41, 0.0 }
  0x28   :  { %v258_v51 = vadd.f32 %v617_v7, %v187_v42  ;;  %v259_v52 = vadd.f32 %v617_v7, %v188_v43  ;;  %v318_v55 = vmax.f32 %v254_v44, 0.0  ;;  %v319_v56 = vmax.f32 %v255_v45, 0.0 }
  0x29   :  { %v320_v57 = vmax.f32 %v256_v46, 0.0  ;;  %v321_v58 = vmax.f32 %v257_v47, 0.0  ;;  %380 = vst [vmem:[%s1026_s3 + $0x100] sm:$0xff] %v316_v49  ;;  %381 = vst [vmem:[%s1026_s3 + $0x108] sm:$0xff] %v317_v50  ;;  %v500_v62 = vunpack.c.l.bf16 %v565_v48  ;;  %v501_v63 = vunpack.c.h.bf16 %v565_v48 }
  0x2a   :  { %v322_v60 = vmax.f32 %v258_v51, 0.0  ;;  %v323_v61 = vmax.f32 %v259_v52, 0.0  ;;  %382 = vst [vmem:[%s1026_s3 + $0x110] sm:$0xff] %v318_v55  ;;  %383 = vst [vmem:[%s1026_s3 + $0x118] sm:$0xff] %v319_v56  ;;  %v504_v0 = vunpack.c.l.bf16 %v566_v53  ;;  %v505_v2 = vunpack.c.h.bf16 %v566_v53 }
  0x2b   :  { %384 = vst [vmem:[%s1026_s3 + $0x120] sm:$0xff] %v320_v57  ;;  %385 = vst [vmem:[%s1026_s3 + $0x128] sm:$0xff] %v321_v58  ;;  %v508_v3 = vunpack.c.l.bf16 %v567_v54  ;;  %v509_v4 = vunpack.c.h.bf16 %v567_v54  ;;  %v189_v5 = vmul.f32 %v500_v62, %v603_v1  ;;  %v190_v6 = vmul.f32 %v501_v63, %v603_v1  ;;  %v573_v58 = vld [vmem:[%s1023_s0 + $0xe0] sm:$0xff]   ;;  %v574_v63 = vld [vmem:[%s1023_s0 + $0xe8] sm:$0xff]  }
  0x2c   :  { %386 = vst [vmem:[%s1026_s3 + $0x130] sm:$0xff] %v322_v60  ;;  %387 = vst [vmem:[%s1026_s3 + $0x138] sm:$0xff] %v323_v61  ;;  %v512_v8 = vunpack.c.l.bf16 %v568_v59  ;;  %v513_v9 = vunpack.c.h.bf16 %v568_v59  ;;  %v191_v10 = vmul.f32 %v504_v0, %v603_v1  ;;  %v192_v11 = vmul.f32 %v505_v2, %v603_v1  ;;  %v575_v0 = vld [vmem:[%s1023_s0 + $0xf0] sm:$0xff]  }
  0x2d   :  { %v193_v12 = vmul.f32 %v508_v3, %v603_v1  ;;  %v194_v13 = vmul.f32 %v509_v4, %v603_v1  ;;  %v260_v14 = vadd.f32 %v617_v7, %v189_v5  ;;  %v261_v15 = vadd.f32 %v617_v7, %v190_v6  ;;  %v576_v6 = vld [vmem:[%s1023_s0 + $0xf8] sm:$0xff]  }
  0x2e   :  { %v195_v16 = vmul.f32 %v512_v8, %v603_v1  ;;  %v196_v17 = vmul.f32 %v513_v9, %v603_v1  ;;  %v262_v18 = vadd.f32 %v617_v7, %v191_v10  ;;  %v263_v19 = vadd.f32 %v617_v7, %v192_v11 }
  0x2f   :  { %v264_v20 = vadd.f32 %v617_v7, %v193_v12  ;;  %v265_v21 = vadd.f32 %v617_v7, %v194_v13  ;;  %v324_v23 = vmax.f32 %v260_v14, 0.0  ;;  %v325_v24 = vmax.f32 %v261_v15, 0.0 }
  0x30   :  { %v266_v25 = vadd.f32 %v617_v7, %v195_v16  ;;  %v267_v26 = vadd.f32 %v617_v7, %v196_v17  ;;  %v326_v29 = vmax.f32 %v262_v18, 0.0  ;;  %v327_v30 = vmax.f32 %v263_v19, 0.0 }
  0x31   :  { %v328_v31 = vmax.f32 %v264_v20, 0.0  ;;  %v329_v32 = vmax.f32 %v265_v21, 0.0  ;;  %388 = vst [vmem:[%s1026_s3 + $0x140] sm:$0xff] %v324_v23  ;;  %389 = vst [vmem:[%s1026_s3 + $0x148] sm:$0xff] %v325_v24  ;;  %v516_v36 = vunpack.c.l.bf16 %v569_v22  ;;  %v517_v37 = vunpack.c.h.bf16 %v569_v22 }
  0x32   :  { %v330_v34 = vmax.f32 %v266_v25, 0.0  ;;  %v331_v35 = vmax.f32 %v267_v26, 0.0  ;;  %390 = vst [vmem:[%s1026_s3 + $0x150] sm:$0xff] %v326_v29  ;;  %391 = vst [vmem:[%s1026_s3 + $0x158] sm:$0xff] %v327_v30  ;;  %v520_v38 = vunpack.c.l.bf16 %v570_v27  ;;  %v521_v39 = vunpack.c.h.bf16 %v570_v27 }
  0x33   :  { %392 = vst [vmem:[%s1026_s3 + $0x160] sm:$0xff] %v328_v31  ;;  %393 = vst [vmem:[%s1026_s3 + $0x168] sm:$0xff] %v329_v32  ;;  %v524_v40 = vunpack.c.l.bf16 %v571_v28  ;;  %v525_v41 = vunpack.c.h.bf16 %v571_v28  ;;  %v197_v42 = vmul.f32 %v516_v36, %v603_v1  ;;  %v198_v43 = vmul.f32 %v517_v37, %v603_v1 }
  0x34   :  { %394 = vst [vmem:[%s1026_s3 + $0x170] sm:$0xff] %v330_v34  ;;  %395 = vst [vmem:[%s1026_s3 + $0x178] sm:$0xff] %v331_v35  ;;  %v528_v44 = vunpack.c.l.bf16 %v572_v33  ;;  %v529_v45 = vunpack.c.h.bf16 %v572_v33  ;;  %v199_v46 = vmul.f32 %v520_v38, %v603_v1  ;;  %v200_v47 = vmul.f32 %v521_v39, %v603_v1 }
  0x35   :  { %v201_v48 = vmul.f32 %v524_v40, %v603_v1  ;;  %v202_v49 = vmul.f32 %v525_v41, %v603_v1  ;;  %v268_v50 = vadd.f32 %v617_v7, %v197_v42  ;;  %v269_v51 = vadd.f32 %v617_v7, %v198_v43 }
  0x36   :  { %v203_v52 = vmul.f32 %v528_v44, %v603_v1  ;;  %v204_v53 = vmul.f32 %v529_v45, %v603_v1  ;;  %v270_v54 = vadd.f32 %v617_v7, %v199_v46  ;;  %v271_v55 = vadd.f32 %v617_v7, %v200_v47 }
  0x37   :  { %v272_v56 = vadd.f32 %v617_v7, %v201_v48  ;;  %v273_v57 = vadd.f32 %v617_v7, %v202_v49  ;;  %v332_v59 = vmax.f32 %v268_v50, 0.0  ;;  %v333_v60 = vmax.f32 %v269_v51, 0.0 }
  0x38   :  { %v274_v61 = vadd.f32 %v617_v7, %v203_v52  ;;  %v275_v62 = vadd.f32 %v617_v7, %v204_v53  ;;  %v334_v2 = vmax.f32 %v270_v54, 0.0  ;;  %v335_v3 = vmax.f32 %v271_v55, 0.0 }
  0x39   :  { %v336_v4 = vmax.f32 %v272_v56, 0.0  ;;  %v337_v5 = vmax.f32 %v273_v57, 0.0  ;;  %396 = vst [vmem:[%s1026_s3 + $0x180] sm:$0xff] %v332_v59  ;;  %397 = vst [vmem:[%s1026_s3 + $0x188] sm:$0xff] %v333_v60  ;;  %v532_v10 = vunpack.c.l.bf16 %v573_v58  ;;  %v533_v11 = vunpack.c.h.bf16 %v573_v58 }
  0x3a   :  { %v338_v8 = vmax.f32 %v274_v61, 0.0  ;;  %v339_v9 = vmax.f32 %v275_v62, 0.0  ;;  %398 = vst [vmem:[%s1026_s3 + $0x190] sm:$0xff] %v334_v2  ;;  %399 = vst [vmem:[%s1026_s3 + $0x198] sm:$0xff] %v335_v3  ;;  %v536_v12 = vunpack.c.l.bf16 %v574_v63  ;;  %v537_v13 = vunpack.c.h.bf16 %v574_v63 }
  0x3b   :  { %400 = vst [vmem:[%s1026_s3 + $0x1a0] sm:$0xff] %v336_v4  ;;  %401 = vst [vmem:[%s1026_s3 + $0x1a8] sm:$0xff] %v337_v5  ;;  %v540_v14 = vunpack.c.l.bf16 %v575_v0  ;;  %v541_v15 = vunpack.c.h.bf16 %v575_v0  ;;  %v205_v16 = vmul.f32 %v532_v10, %v603_v1  ;;  %v206_v17 = vmul.f32 %v533_v11, %v603_v1 }
  0x3c   :  { %402 = vst [vmem:[%s1026_s3 + $0x1b0] sm:$0xff] %v338_v8  ;;  %403 = vst [vmem:[%s1026_s3 + $0x1b8] sm:$0xff] %v339_v9  ;;  %v544_v18 = vunpack.c.l.bf16 %v576_v6  ;;  %v545_v19 = vunpack.c.h.bf16 %v576_v6  ;;  %v207_v20 = vmul.f32 %v536_v12, %v603_v1  ;;  %v208_v21 = vmul.f32 %v537_v13, %v603_v1 }
  0x3d   :  { %v209_v22 = vmul.f32 %v540_v14, %v603_v1  ;;  %v210_v23 = vmul.f32 %v541_v15, %v603_v1  ;;  %v276_v24 = vadd.f32 %v617_v7, %v205_v16  ;;  %v277_v25 = vadd.f32 %v617_v7, %v206_v17 }
  0x3e   :  { %v211_v26 = vmul.f32 %v544_v18, %v603_v1  ;;  %v212_v27 = vmul.f32 %v545_v19, %v603_v1  ;;  %v278_v28 = vadd.f32 %v617_v7, %v207_v20  ;;  %v279_v29 = vadd.f32 %v617_v7, %v208_v21 }
  0x3f   :  { %v280_v30 = vadd.f32 %v617_v7, %v209_v22  ;;  %v281_v31 = vadd.f32 %v617_v7, %v210_v23  ;;  %v340_v32 = vmax.f32 %v276_v24, 0.0  ;;  %v341_v33 = vmax.f32 %v277_v25, 0.0 }
  0x40   :  { %v282_v34 = vadd.f32 %v617_v7, %v211_v26  ;;  %v283_v35 = vadd.f32 %v617_v7, %v212_v27  ;;  %v342_v36 = vmax.f32 %v278_v28, 0.0  ;;  %v343_v37 = vmax.f32 %v279_v29, 0.0 }
  0x41   :  { %v344_v38 = vmax.f32 %v280_v30, 0.0  ;;  %v345_v39 = vmax.f32 %v281_v31, 0.0  ;;  %404 = vst [vmem:[%s1026_s3 + $0x1c0] sm:$0xff] %v340_v32  ;;  %405 = vst [vmem:[%s1026_s3 + $0x1c8] sm:$0xff] %v341_v33 }
  0x42   :  { %v346_v1 = vmax.f32 %v282_v34, 0.0  ;;  %v347_v40 = vmax.f32 %v283_v35, 0.0  ;;  %406 = vst [vmem:[%s1026_s3 + $0x1d0] sm:$0xff] %v342_v36  ;;  %407 = vst [vmem:[%s1026_s3 + $0x1d8] sm:$0xff] %v343_v37 }
  0x43   :  { %408 = vst [vmem:[%s1026_s3 + $0x1e0] sm:$0xff] %v344_v38  ;;  %409 = vst [vmem:[%s1026_s3 + $0x1e8] sm:$0xff] %v345_v39 }
  0x44   :  { %410 = vst [vmem:[%s1026_s3 + $0x1f0] sm:$0xff] %v346_v1  ;;  %411 = vst [vmem:[%s1026_s3 + $0x1f8] sm:$0xff] %v347_v40 }

// kernel: cbr_forward.2
= control target key start
LH: loop header
LB: loop body
LE: loop exit
PB: predicated region body
PF: predicated region fallthrough
CT: control target
= control target key end

     0   :  { %s2717_s12 = smov 0   ;;  %s2719_s13 = smov 0   ;;  %s3542_s0 = inlined_call_operand.vmem [shape: bf16[2,16,18,24], index: 0, kind: input, shape index: {}]   ;;  %s3543_s1 = inlined_call_operand.vmem [shape: bf16[3,24,128], index: 1, kind: input, shape index: {}]   ;;  %s3544_s2 = inlined_call_operand.vmem [shape: bf16[512,128], index: 2, kind: output, shape index: {0}]   ;;  %s3545_s3 = inlined_call_operand.vmem [shape: f32[2,1,2,128], index: 3, kind: output, shape index: {1}]  }
   0x1   :  { %s2721_s14 = smov 0  }
   0x2 LB: > { %s26_s15 = sadd.s32 1, %s2691_s13  ;;  %p2102_p0 = scmp.ge.s32.totalorder %s2695_s14, 1  ;;  %s2695_s14 = sphi %s2721_s14, %s14_s14   ;;  %s2691_s13 = sphi %s2719_s13, %s3551_s13   ;;  %s2687_s12 = sphi %s2717_s12, %s3550_s12  }
   0x3   : > { %p28_p1 = scmp.ge.s32.totalorder %s26_s15, 2  ;;  %p164_p2 = scmp.lt.s32.totalorder %s2695_s14, 3 }
   0x5   : > { %s3553_s15 = smov (%p28_p1, %s26_s15), 0  ;;  %p165_p3 = pnand %p2102_p0, %p164_p2 }
   0x6   : > { %v2740_v0 = vld [vmem:[%s3543_s1] sm:$0xff] (!%p165_p3)   ;;  %vm776_vm0 = vcmask (!%p165_p3), 1043456   ;;  %v2745_v1 = vld [vmem:[%s3543_s1 + $0x8] ss:$0 sps:$4 sm:$0xff] (!%p165_p3)   ;;  %p202_p4 = scmp.lt.s32.totalorder (!%p165_p3), %s2687_s12, 1  ;;  %v2654_v2 = vld [vmem:[%s3543_s1 + $0xc] sm:$0xff] (!%p165_p3)  }
   0x7   : > { %168 = sbr.rel (%p165_p3) target bundleno = 459 (0x1cb), region = 28  ;;  %2482 = vmatprep.subr.bf16.mxu0 (!%p165_p3), %v2740_v0  ;;  %v2656_v3 = vld [vmem:[%s3543_s1 + $0x14] ss:$0 sps:$4 sm:$0xff] (!%p165_p3)   ;;  %v2763_v4 = vsel (!%p165_p3), %vm776_vm0, %v2745_v1, 0  ;;  %2446 = vmatprep.subr.bf16.mxu1 (!%p165_p3), %v2654_v2  ;;  %v2659_v5 = vld [vmem:[%s3543_s1 + $0x18] sm:$0xff] (!%p165_p3)   ;;  %vm727_vm1 = vcmask (!%p165_p3), 195584  }
   0x8   : > { %2483 = vmatpush3.bf16.msra.mxu0 (!%p165_p3), %v2740_v0  ;;  %2447 = vmatpush3.bf16.msra.mxu1 (!%p165_p3), %v2654_v2  ;;  %v778_v6 = vsel (!%p165_p3), %vm776_vm0, %v2656_v3, 0  ;;  %vm279_vm2 = vsmask.f32 (!%p165_p3), 3328  ;;  %vm280_vm3 = vsmask.f32 (!%p165_p3), 7440  ;;  %vm1258_vm5 = vcmask (!%p165_p3), 1042432  }
   0x9   : > { %2623 = vmatprep.subr.msk.bf16.mxu0 (!%p165_p3), %vm776_vm0, %v2745_v1  ;;  %2622 = vmatprep.subr.msk.bf16.mxu1 (!%p165_p3), %vm776_vm0, %v2656_v3  ;;  %v2797_v15 = vld [vmem:[%s3543_s1 + $0x20] ss:$0 sps:$4 sm:$0xff] (!%p165_p3)   ;;  %vm2853_vm4 = vmor (!%p165_p3), %vm279_vm2, %vm280_vm3  ;;  %vm1259_vm6 = vcmask (!%p165_p3), 1046532   ;;  %s2104_s6 = sshll.u32 (!%p165_p3), %s2687_s12, 5  ;;  %vm1977_vm8 = vcmask (!%p165_p3), 1040384  }
   0xa   : > { %vm2958_vm7 = vmor (!%p165_p3), %vm1258_vm5, %vm1259_vm6  ;;  %p214_p5 = scmp.lt.s32.totalorder (!%p165_p3), %s2104_s6, 63 }
   0xc   : > { %2485 = vmatpush3.bf16.msra.mxu0 (!%p165_p3), %v2763_v4  ;;  %2449 = vmatpush3.bf16.msra.mxu1 (!%p165_p3), %v778_v6 }
   0xd   : > { %2518 = vmatprep.subr.bf16.mxu0 (!%p165_p3), %v2659_v5  ;;  %2554 = vmatprep.subr.bf16.mxu1 (!%p165_p3), %v2740_v0 }
   0xe   : > { %s2754_s22 = scalar_select %p202_p4, %s2687_s12, 1 }
   0xf   : > { %s3555_s6 = smov (!%p214_p5, %s2104_s6), 63 }
  0x10   : > { %s2626_s25 = smul.u32 192, %s2754_s22  ;;  %s2105_s7 = sshll.u32 %s3555_s6, 2 }
  0x11   : > { %s3319_s10 = scalar_lea.vmem %s3544_s2, %s2105_s7  ;;  %s2106_s11 = sshll.u32 %s2754_s22, 1 }
  0x12   : > { %s2775_s30 = scalar_lea.vmem %s3542_s0, %s2626_s25  ;;  %s226_s17 = scalar_lea.vmem %s3545_s3, %s2106_s11 }
  0x13   : > { %v2778_v7 = vld [vmem:[%s2775_s30] sm:$0xf]  ;;  %v2781_v8 = vld [vmem:[%s2775_s30 + $0x4] sm:$0xf]  ;;  %v2784_v9 = vld [vmem:[%s2775_s30 + $0xc] sm:$0xf] }
  0x14   : > { %v283_v10 = vshrl.u32 %v2778_v7, 16  ;;  %v286_v11 = vshll.u32 %v2778_v7, 16  ;;  %v296_v12 = vshrl.u32 %v2781_v8, 16  ;;  %v2144_v13 = vcombine.low %v2778_v7, %v2781_v8  ;;  %v2792_v14 = vld [vmem:[%s2775_s30 + $0x10] sm:$0xf] }
  0x15   : > { %v2178_v16 = vrot.slane %v2778_v7, 9  ;;  %v1263_v17 = vrot.slane %v2781_v8, 5  ;;  %v307_v18 = vshrl.u32 %v2784_v9, 16  ;;  %v310_v19 = vshll.u32 %v2784_v9, 16  ;;  %v2804_v20 = vld [vmem:[%s2775_s30 + $0x18] sm:$0xf] }
  0x16   : > { %2486 = vmatprep.mubr.msk.bf16.mxu0 %vm727_vm1, %v2144_v13  ;;  %v320_v21 = vshrl.u32 %v2792_v14, 16  ;;  %v2145_v22 = vcombine.low %v2784_v9, %v2792_v14  ;;  %v2179_v23 = vrot.slane %v2784_v9, 9  ;;  %v1270_v24 = vrot.slane %v2792_v14, 5  ;;  %v2814_v25 = vld [vmem:[%s2775_s30 + $0x1c] sm:$0xf] }
  0x17   : > { %v2818_v26 = vrot.slane %v1263_v17, 4  ;;  %v331_v27 = vshrl.u32 %v2804_v20, 16  ;;  %v334_v28 = vshll.u32 %v2804_v20, 16  ;;  %v344_v29 = vshrl.u32 %v2814_v25, 16  ;;  %v2824_v30 = vld [vmem:[%s2775_s30 + $0x8] sm:$0x1] }
  0x18   : > { %2487 = vmatmul.mubr.msk.bf16.vlgmr.msra.gmra.mrb[0].mxu0 %vm727_vm1, %v2145_v22  ;;  %v2829_v31 = vrot.slane %v1270_v24, 4  ;;  %v2146_v32 = vcombine.low %v2804_v20, %v2814_v25  ;;  %v285_v33 = vrot.slane %v283_v10, 4  ;;  %v288_v34 = vrot.slane %v286_v11, 5  ;;  %v2834_v35 = vld [vmem:[%s2775_s30 + $0x24] sm:$0xf] }
  0x19   : > { %v292_v36 = vshll.u32 %v2781_v8, 16  ;;  %v298_v37 = vrot.slane %v296_v12, 4  ;;  %v302_v38 = vshll.u32 %v2824_v30, 16  ;;  %v1266_v39 = vrot.slane %v2824_v30, 5  ;;  %v2840_v40 = vld [vmem:[%s2775_s30 + $0x28] sm:$0xf]  ;;  %2519 = vmatpush3.bf16.msra.mxu0 %v2659_v5 }
  0x1a   : > { %2490 = vmatprep.mubr.msk.bf16.mxu0 %vm727_vm1, %v2146_v32  ;;  %v289_v41 = vor.u32 %v288_v34, %v285_v33  ;;  %v355_v42 = vshrl.u32 %v2834_v35, 16  ;;  %v358_v43 = vshll.u32 %v2834_v35, 16  ;;  %v368_v44 = vshrl.u32 %v2840_v40, 16  ;;  %v2847_v45 = vld [vmem:[%s2775_s30 + $0x14] sm:$0x1]  ;;  %2625 = vmatprep.subr.msk.bf16.mxu0 %vm776_vm0, %v2797_v15 }
  0x1b   : > { %v294_v47 = vrot.slane %v292_v36, 5  ;;  %v304_v48 = vrot.slane %v302_v38, 5  ;;  %v2147_v49 = vcombine.low %v2834_v35, %v2840_v40  ;;  %v309_v50 = vrot.slane %v307_v18, 4  ;;  %v2860_v51 = vld [vmem:[%s2775_s30 + $0x30] sm:$0xf] }
  0x1c   : > { %v290_v52 = vrot.slane %v289_v41, 4  ;;  %v312_v53 = vrot.slane %v310_v19, 5  ;;  %v316_v54 = vshll.u32 %v2792_v14, 16  ;;  %v322_v55 = vrot.slane %v320_v21, 4  ;;  %v2864_v56 = vld [vmem:[%s2775_s30 + $0x34] sm:$0xf] }
  0x1d   : > { %v299_v57 = vor.u32 %v298_v37, %v294_v47  ;;  %v326_v58 = vshll.u32 %v2847_v45, 16  ;;  %v1273_v59 = vrot.slane %v2847_v45, 5  ;;  %v379_v60 = vshrl.u32 %v2860_v51, 16  ;;  %v2873_v3 = vld [vmem:[%s2775_s30 + $0x20] sm:$0x1] }
  0x1e   : > { %v295_v61 = vsel %vm2853_vm4, %v290_v52, %v294_v47  ;;  %v313_v62 = vor.u32 %v312_v53, %v309_v50  ;;  %v318_v63 = vrot.slane %v316_v54, 5  ;;  %v382_v2 = vshll.u32 %v2860_v51, 16  ;;  %v2880_v21 = vld [vmem:[%s2775_s30 + $0x3c] sm:$0xf]  ;;  %v2888_v36 = vld [vmem:[%s2775_s30 + $0x40] sm:$0xf] }
  0x1f   : > { %v300_v5 = vrot.slane %v299_v57, 4  ;;  %v328_v6 = vrot.slane %v326_v58, 5  ;;  %v392_v10 = vshrl.u32 %v2864_v56, 16  ;;  %v2148_v11 = vcombine.low %v2860_v51, %v2864_v56  ;;  %v2895_v50 = vld [vmem:[%s2775_s30 + $0x2c] sm:$0x1] }
  0x20   : > { %2491 = vmatmul.mubr.msk.bf16.gmra.mrb[4].mxu0 %vm727_vm1, %v2147_v49  ;;  %v314_v12 = vrot.slane %v313_v62, 4  ;;  %v323_v13 = vor.u32 %v322_v55, %v318_v63  ;;  %v333_v18 = vrot.slane %v331_v27, 4  ;;  %v336_v19 = vrot.slane %v334_v28, 5  ;;  %v2904_v55 = vld [vmem:[%s2775_s30 + $0x48] sm:$0xf] }
  0x21   : > { %v305_v22 = vsel %vm2853_vm4, %v300_v5, %v304_v48  ;;  %2494 = vmatprep.mubr.msk.bf16.mxu0 %vm727_vm1, %v2148_v11  ;;  %v340_v32 = vshll.u32 %v2814_v25, 16  ;;  %v346_v33 = vrot.slane %v344_v29, 4  ;;  %v350_v34 = vshll.u32 %v2873_v3, 16  ;;  %v3009_v45 = vld [vmem:[%s2775_s30 + $0x60] sm:$0xf] }
  0x22   : > { %v2110_v37 = vcombine.low %v295_v61, %v305_v22  ;;  %v319_v27 = vsel %vm2853_vm4, %v314_v12, %v318_v63  ;;  %v324_v28 = vrot.slane %v323_v13, 4  ;;  %v337_v38 = vor.u32 %v336_v19, %v333_v18  ;;  %v2907_v63 = vld [vmem:[%s2775_s30 + $0x4c] sm:$0xf]  ;;  %v2919_v19 = vld [vmem:[%s2775_s30 + $0x38] sm:$0x1] }
  0x23   : > { %v342_v41 = vrot.slane %v340_v32, 5  ;;  %v352_v47 = vrot.slane %v350_v34, 5  ;;  %v403_v48 = vshrl.u32 %v2880_v21, 16  ;;  %v406_v49 = vshll.u32 %v2880_v21, 16  ;;  %v2927_v34 = vld [vmem:[%s2775_s30 + $0x54] sm:$0xf] }
  0x24   : > { %2450 = vmatprep.mubr.msk.bf16.mxu1 %vm727_vm1, %v2110_v37  ;;  %v329_v29 = vsel %vm2853_vm4, %v324_v28, %v328_v6  ;;  %v338_v52 = vrot.slane %v337_v38, 4  ;;  %v416_v53 = vshrl.u32 %v2888_v36, 16  ;;  %v2149_v54 = vcombine.low %v2880_v21, %v2888_v36 }
  0x25   : > { %v2111_v57 = vcombine.low %v319_v27, %v329_v29  ;;  %v347_v58 = vor.u32 %v346_v33, %v342_v41  ;;  %v357_v61 = vrot.slane %v355_v42, 4  ;;  %v360_v62 = vrot.slane %v358_v43, 5 }
  0x26   : > { %v343_v5 = vsel %vm2853_vm4, %v338_v52, %v342_v41  ;;  %v364_v6 = vshll.u32 %v2840_v40, 16  ;;  %v370_v11 = vrot.slane %v368_v44, 4  ;;  %v374_v12 = vshll.u32 %v2895_v50, 16 }
  0x27   : > { %2451 = vmatmul.mubr.msk.bf16.vlgmr.msra.gmra.mrb[0].mxu1 %vm727_vm1, %v2111_v57  ;;  %v348_v13 = vrot.slane %v347_v58, 4  ;;  %v361_v18 = vor.u32 %v360_v62, %v357_v61  ;;  %v427_v42 = vshrl.u32 %v2904_v55, 16  ;;  %v430_v43 = vshll.u32 %v2904_v55, 16 }
  0x28   : > { %2556 = vmatpush3.bf16.msra.mxu1 %v2740_v0  ;;  %2495 = vmatmul.mubr.msk.bf16.gmra.mrb[8].mxu0 %vm727_vm1, %v2149_v54  ;;  %v366_v22 = vrot.slane %v364_v6, 5  ;;  %v376_v32 = vrot.slane %v374_v12, 5  ;;  %v440_v44 = vshrl.u32 %v2907_v63, 16  ;;  %v2150_v33 = vcombine.low %v2904_v55, %v2907_v63  ;;  %v2934_v0 = vld [vmem:[%s2775_s30 + $0x58] sm:$0xf] }
  0x29   : > { %v353_v37 = vsel %vm2853_vm4, %v348_v13, %v352_v47  ;;  %v362_v27 = vrot.slane %v361_v18, 4  ;;  %v381_v28 = vrot.slane %v379_v60, 4  ;;  %v384_v38 = vrot.slane %v382_v2, 5  ;;  %2624 = vmatprep.subr.msk.bf16.mxu1 %vm776_vm0, %v2745_v1 }
  0x2a   : > { %v2112_v41 = vcombine.low %v343_v5, %v353_v37  ;;  %v371_v29 = vor.u32 %v370_v11, %v366_v22  ;;  %2498 = vmatprep.mubr.msk.bf16.mxu0 %vm727_vm1, %v2150_v33  ;;  %v388_v52 = vshll.u32 %v2864_v56, 16  ;;  %v394_v54 = vrot.slane %v392_v10, 4  ;;  %v2948_v5 = vld [vmem:[%s2775_s30 + $0x44] sm:$0x1] }
  0x2b   : > { %v367_v47 = vsel %vm2853_vm4, %v362_v27, %v366_v22  ;;  %v385_v57 = vor.u32 %v384_v38, %v381_v28  ;;  %v398_v60 = vshll.u32 %v2919_v19, 16  ;;  %v451_v2 = vshrl.u32 %v2927_v34, 16 }
  0x2c   : > { %2454 = vmatprep.mubr.msk.bf16.mxu1 %vm727_vm1, %v2112_v41  ;;  %v372_v58 = vrot.slane %v371_v29, 4  ;;  %v390_v61 = vrot.slane %v388_v52, 5  ;;  %v454_v1 = vshll.u32 %v2927_v34, 16  ;;  %v464_v62 = vshrl.u32 %v2934_v0, 16  ;;  %2557 = vmatpush3.bf16.msra.mxu1 %v2763_v4 }
  0x2d   : > { %v386_v10 = vrot.slane %v385_v57, 4  ;;  %v400_v6 = vrot.slane %v398_v60, 5  ;;  %v2151_v11 = vcombine.low %v2927_v34, %v2934_v0  ;;  %v405_v12 = vrot.slane %v403_v48, 4 }
  0x2e   : > { %v377_v13 = vsel %vm2853_vm4, %v372_v58, %v376_v32  ;;  %v395_v18 = vor.u32 %v394_v54, %v390_v61  ;;  %v408_v22 = vrot.slane %v406_v49, 5  ;;  %v412_v33 = vshll.u32 %v2888_v36, 16  ;;  %v2981_v54 = vld [vmem:[%s2775_s30 + $0x50] sm:$0x1] }
  0x2f   : > { %v2113_v4 = vcombine.low %v367_v47, %v377_v13  ;;  %v391_v27 = vsel %vm2853_vm4, %v386_v10, %v390_v61  ;;  %v418_v28 = vrot.slane %v416_v53, 4  ;;  %v422_v48 = vshll.u32 %v2948_v5, 16  ;;  %v3003_v10 = vld [vmem:[%s2775_s30 + $0x5c] sm:$0x1] }
  0x30   : > { %v396_v38 = vrot.slane %v395_v18, 4  ;;  %2499 = vmatmul.mubr.msk.bf16.gmra.mrb[12].mxu0 %vm727_vm1, %v2151_v11  ;;  %v409_v49 = vor.u32 %v408_v22, %v405_v12  ;;  %v414_v32 = vrot.slane %v412_v33, 5  ;;  %v1483_v41 = vsel %vm776_vm0, %v2797_v15, 0 }
  0x31   : > { %2455 = vmatmul.mubr.msk.bf16.gmra.mrb[4].mxu1 %vm727_vm1, %v2113_v4  ;;  %v424_v29 = vrot.slane %v422_v48, 5  ;;  %2521 = vmatpush3.bf16.msra.mxu0 %v1483_v41  ;;  %v1264_v53 = vsel %vm2958_vm7, %v2178_v16, %v1263_v17  ;;  %v1267_v52 = vsel %vm2958_vm7, %v2818_v26, %v1266_v39  ;;  %v429_v15 = vrot.slane %v427_v42, 4 }
  0x32   : > { %v401_v47 = vsel %vm2853_vm4, %v396_v38, %v400_v6  ;;  %v410_v57 = vrot.slane %v409_v49, 4  ;;  %v419_v8 = vor.u32 %v418_v28, %v414_v32  ;;  %v2197_v60 = vcombine.low %v1264_v53, %v1267_v52  ;;  %v3020_v49 = vld [vmem:[%s2775_s30 + $0x64] sm:$0xf]  ;;  %v3028_v53 = vld [vmem:[%s2775_s30 + $0x68] sm:$0x1] }
  0x33   : > { %v2114_v7 = vcombine.low %v391_v27, %v401_v47  ;;  %v432_v58 = vrot.slane %v430_v43, 5  ;;  %v436_v16 = vshll.u32 %v2907_v63, 16  ;;  %v442_v17 = vrot.slane %v440_v44, 4 }
  0x34   : > { %v415_v30 = vsel %vm2853_vm4, %v410_v57, %v414_v32  ;;  %v420_v61 = vrot.slane %v419_v8, 4  ;;  %2522 = vmatprep.mubr.msk.bf16.mxu0 %vm727_vm1, %v2197_v60  ;;  %v446_v26 = vshll.u32 %v2981_v54, 16  ;;  %v1271_v39 = vsel %vm2958_vm7, %v2179_v23, %v1270_v24 }
  0x35   : > { %2458 = vmatprep.mubr.msk.bf16.mxu1 %vm727_vm1, %v2114_v7  ;;  %v433_v42 = vor.u32 %v432_v58, %v429_v15  ;;  %v438_v43 = vrot.slane %v436_v16, 5  ;;  %v1274_v44 = vsel %vm2958_vm7, %v2829_v31, %v1273_v59  ;;  %v453_v6 = vrot.slane %v451_v2, 4 }
  0x36   : > { %v425_v9 = vsel %vm2853_vm4, %v420_v61, %v424_v29  ;;  %v448_v14 = vrot.slane %v446_v26, 5  ;;  %v2198_v11 = vcombine.low %v1271_v39, %v1274_v44  ;;  %v456_v12 = vrot.slane %v454_v1, 5 }
  0x37   : > { %v2115_v23 = vcombine.low %v415_v30, %v425_v9  ;;  %v434_v24 = vrot.slane %v433_v42, 4  ;;  %v443_v13 = vor.u32 %v442_v17, %v438_v43  ;;  %v460_v18 = vshll.u32 %v2934_v0, 16  ;;  %v3041_v30 = vld [vmem:[%s2775_s30 + $0x6c] sm:$0xf] }
  0x38   : > { %2523 = vmatmul.mubr.msk.bf16.vlgmr.msra.gmra.mrb[0].mxu0 %vm727_vm1, %v2198_v11  ;;  %v457_v31 = vor.u32 %v456_v12, %v453_v6  ;;  %v466_v59 = vrot.slane %v464_v62, 4  ;;  %v470_v2 = vshll.u32 %v3003_v10, 16  ;;  %v2180_v22 = vrot.slane %v2804_v20, 9  ;;  %v3052_v11 = vld [vmem:[%s2775_s30 + $0x74] sm:$0x1] }
  0x39   : > { %2459 = vmatmul.mubr.msk.bf16.gmra.mrb[8].mxu1 %vm727_vm1, %v2115_v23  ;;  %v439_v1 = vsel %vm2853_vm4, %v434_v24, %v438_v43  ;;  %v444_v33 = vrot.slane %v443_v13, 4  ;;  %v462_v4 = vrot.slane %v460_v18, 5  ;;  %v1277_v27 = vrot.slane %v2814_v25, 5  ;;  %v3047_v43 = vld [vmem:[%s2775_s30 + $0x70] sm:$0xf] }
  0x3a   : > { %v458_v28 = vrot.slane %v457_v31, 4  ;;  %v472_v48 = vrot.slane %v470_v2, 5  ;;  %v1280_v38 = vrot.slane %v2873_v3, 5  ;;  %v475_v62 = vshrl.u32 %v3009_v45, 16 }
  0x3b   : > { %v449_v20 = vsel %vm2853_vm4, %v444_v33, %v448_v14  ;;  %v467_v32 = vor.u32 %v466_v59, %v462_v4  ;;  %v1278_v41 = vsel %vm2958_vm7, %v2180_v22, %v1277_v27  ;;  %v1279_v29 = vrot.slane %v1277_v27, 4 }
  0x3c   : > { %v2116_v25 = vcombine.low %v439_v1, %v449_v20  ;;  %v463_v52 = vsel %vm2853_vm4, %v458_v28, %v462_v4  ;;  %v477_v3 = vrot.slane %v475_v62, 4  ;;  %v478_v15 = vshll.u32 %v3009_v45, 16  ;;  %v3067_v28 = vld [vmem:[%s2775_s30 + $0x78] sm:$0xf] }
  0x3d   : > { %v468_v47 = vrot.slane %v467_v32, 4  ;;  %v1281_v57 = vsel %vm2958_vm7, %v1279_v29, %v1280_v38  ;;  %v484_v8 = vshll.u32 %v3020_v49, 16  ;;  %v488_v60 = vshrl.u32 %v3020_v49, 16 }
  0x3e   : > { %2462 = vmatprep.mubr.msk.bf16.mxu1 %vm727_vm1, %v2116_v25  ;;  %v2199_v7 = vcombine.low %v1278_v41, %v1281_v57  ;;  %v480_v58 = vrot.slane %v478_v15, 5  ;;  %v494_v16 = vshll.u32 %v3028_v53, 16  ;;  %v2181_v17 = vrot.slane %v2834_v35, 9  ;;  %v3079_v15 = vld [vmem:[%s2775_s30 + $0x80] sm:$0x1] }
  0x3f   : > { %v473_v61 = vsel %vm2853_vm4, %v468_v47, %v472_v48  ;;  %v486_v26 = vrot.slane %v484_v8, 5  ;;  %v490_v39 = vrot.slane %v488_v60, 4  ;;  %v1284_v42 = vrot.slane %v2840_v40, 5  ;;  %v3070_v48 = vld [vmem:[%s2775_s30 + $0x7c] sm:$0xf] }
  0x40   : > { %v2117_v44 = vcombine.low %v463_v52, %v473_v61  ;;  %2526 = vmatprep.mubr.msk.bf16.mxu0 %vm727_vm1, %v2199_v7  ;;  %v481_v6 = vor.u32 %v480_v58, %v477_v3  ;;  %v496_v9 = vrot.slane %v494_v16, 5  ;;  %v1287_v14 = vrot.slane %v2895_v50, 5 }
  0x41   : > { %v491_v35 = vor.u32 %v490_v39, %v486_v26  ;;  %v1285_v12 = vsel %vm2958_vm7, %v2181_v17, %v1284_v42  ;;  %v1286_v23 = vrot.slane %v1284_v42, 4  ;;  %v499_v40 = vshrl.u32 %v3041_v30, 16 }
  0x42   : > { %2463 = vmatmul.mubr.msk.bf16.gmra.mrb[12].mxu1 %vm727_vm1, %v2117_v44  ;;  %v482_v24 = vrot.slane %v481_v6, 4  ;;  %v502_v13 = vshll.u32 %v3041_v30, 16  ;;  %v508_v18 = vshll.u32 %v3047_v43, 16  ;;  %v512_v50 = vshrl.u32 %v3047_v43, 16  ;;  %v3094_v44 = vld [vmem:[%s2775_s30 + $0x84] sm:$0xf] }
  0x43   : > { %v492_v31 = vrot.slane %v491_v35, 4  ;;  %v1288_v59 = vsel %vm2958_vm7, %v1286_v23, %v1287_v14  ;;  %v501_v2 = vrot.slane %v499_v40, 4  ;;  %v518_v22 = vshll.u32 %v3052_v11, 16 }
  0x44   : > { %v487_v1 = vsel %vm2853_vm4, %v482_v24, %v486_v26  ;;  %v2200_v33 = vcombine.low %v1285_v12, %v1288_v59  ;;  %v504_v4 = vrot.slane %v502_v13, 5  ;;  %v510_v27 = vrot.slane %v508_v18, 5  ;;  %v3100_v12 = vld [vmem:[%s2775_s30 + $0x88] sm:$0xf] }
  0x45   : > { %v497_v38 = vsel %vm2853_vm4, %v492_v31, %v496_v9  ;;  %v514_v62 = vrot.slane %v512_v50, 4  ;;  %v520_v20 = vrot.slane %v518_v22, 5  ;;  %v2182_v32 = vrot.slane %v2860_v51, 9  ;;  %v3106_v31 = vld [vmem:[%s2775_s30 + $0x8c] sm:$0x1] }
  0x46   : > { %v2118_v41 = vcombine.low %v487_v1, %v497_v38  ;;  %2527 = vmatmul.mubr.msk.bf16.gmra.mrb[4].mxu0 %vm727_vm1, %v2200_v33  ;;  %v505_v29 = vor.u32 %v504_v4, %v501_v2  ;;  %v1291_v25 = vrot.slane %v2864_v56, 5  ;;  %v1294_v52 = vrot.slane %v2919_v19, 5 }
  0x47   : > { %v515_v3 = vor.u32 %v514_v62, %v510_v27  ;;  %v523_v47 = vshrl.u32 %v3067_v28, 16  ;;  %v526_v57 = vshll.u32 %v3067_v28, 16  ;;  %v532_v8 = vshll.u32 %v3070_v48, 16 }
  0x48   : > { %2466 = vmatprep.mubr.msk.bf16.mxu1 %vm727_vm1, %v2118_v41  ;;  %v506_v51 = vrot.slane %v505_v29, 4  ;;  %v1292_v60 = vsel %vm2958_vm7, %v2182_v32, %v1291_v25  ;;  %v1293_v56 = vrot.slane %v1291_v25, 4  ;;  %v536_v19 = vshrl.u32 %v3070_v48, 16  ;;  %v3123_v41 = vld [vmem:[%s2775_s30 + $0x90] sm:$0xf] }
  0x49   : > { %v516_v7 = vrot.slane %v515_v3, 4  ;;  %v525_v58 = vrot.slane %v523_v47, 4  ;;  %v528_v16 = vrot.slane %v526_v57, 5  ;;  %v534_v17 = vrot.slane %v532_v8, 5  ;;  %v3126_v47 = vld [vmem:[%s2775_s30 + $0x94] sm:$0xf] }
  0x4a   : > { %v511_v61 = vsel %vm2853_vm4, %v506_v51, %v510_v27  ;;  %v1295_v26 = vsel %vm2958_vm7, %v1293_v56, %v1294_v52  ;;  %v538_v39 = vrot.slane %v536_v19, 4  ;;  %v542_v42 = vshll.u32 %v3079_v15, 16 }
  0x4b   : > { %v521_v6 = vsel %vm2853_vm4, %v516_v7, %v520_v20  ;;  %v2201_v9 = vcombine.low %v1292_v60, %v1295_v26  ;;  %v529_v14 = vor.u32 %v528_v16, %v525_v58  ;;  %v2183_v35 = vrot.slane %v2880_v21, 9  ;;  %v3134_v7 = vld [vmem:[%s2775_s30 + $0x98] sm:$0x1] }
  0x4c   : > { %v2119_v23 = vcombine.low %v511_v61, %v521_v6  ;;  %v539_v40 = vor.u32 %v538_v39, %v534_v17  ;;  %v544_v24 = vrot.slane %v542_v42, 5  ;;  %v1298_v13 = vrot.slane %v2888_v36, 5 }
  0x4d   : > { %2530 = vmatprep.mubr.msk.bf16.mxu0 %vm727_vm1, %v2201_v9  ;;  %v530_v18 = vrot.slane %v529_v14, 4  ;;  %v1301_v50 = vrot.slane %v2948_v5, 5  ;;  %v547_v59 = vshrl.u32 %v3094_v44, 16  ;;  %v550_v2 = vshll.u32 %v3094_v44, 16 }
  0x4e   : > { %2467 = vmatmul.mubr.msk.bf16.gmra.mrb[16].mxu1 %vm727_vm1, %v2119_v23  ;;  %v540_v21 = vrot.slane %v539_v40, 4  ;;  %v1299_v22 = vsel %vm2958_vm7, %v2183_v35, %v1298_v13  ;;  %v1300_v36 = vrot.slane %v1298_v13, 4  ;;  %v556_v1 = vshll.u32 %v3100_v12, 16  ;;  %v3148_v23 = vld [vmem:[%s2775_s30 + $0x9c] sm:$0xf] }
  0x4f   : > { %v535_v5 = vsel %vm2853_vm4, %v530_v18, %v534_v17  ;;  %v549_v33 = vrot.slane %v547_v59, 4  ;;  %v552_v4 = vrot.slane %v550_v2, 5  ;;  %v560_v27 = vshrl.u32 %v3100_v12, 16 }
  0x50   : > { %v545_v38 = vsel %vm2853_vm4, %v540_v21, %v544_v24  ;;  %v1302_v62 = vsel %vm2958_vm7, %v1300_v36, %v1301_v50  ;;  %v558_v20 = vrot.slane %v556_v1, 5  ;;  %v566_v32 = vshll.u32 %v3106_v31, 16  ;;  %v3154_v50 = vld [vmem:[%s2775_s30 + $0xa0] sm:$0xf] }
  0x51   : > { %v2120_v29 = vcombine.low %v535_v5, %v545_v38  ;;  %v2202_v25 = vcombine.low %v1299_v22, %v1302_v62  ;;  %v553_v52 = vor.u32 %v552_v4, %v549_v33  ;;  %v562_v3 = vrot.slane %v560_v27, 4  ;;  %v3160_v5 = vld [vmem:[%s2775_s30 + $0xa4] sm:$0x1]  ;;  %v3169_v62 = vld [vmem:[%s2775_s30 + $0xa8] sm:$0xf] }
  0x52   : > { %v568_v57 = vrot.slane %v566_v32, 5  ;;  %v2184_v8 = vrot.slane %v2904_v55, 9  ;;  %v1305_v51 = vrot.slane %v2907_v63, 5  ;;  %v1308_v60 = vrot.slane %v2981_v54, 5 }
  0x53   : > { %2470 = vmatprep.mubr.msk.bf16.mxu1 %vm727_vm1, %v2120_v29  ;;  %2531 = vmatmul.mubr.msk.bf16.gmra.mrb[8].mxu0 %vm727_vm1, %v2202_v25  ;;  %v554_v56 = vrot.slane %v553_v52, 4  ;;  %v563_v19 = vor.u32 %v562_v3, %v558_v20  ;;  %v571_v58 = vshrl.u32 %v3123_v41, 16  ;;  %v574_v16 = vshll.u32 %v3123_v41, 16  ;;  %v3175_v25 = vld [vmem:[%s2775_s30 + $0xac] sm:$0xf] }
  0x54   : > { %v1306_v55 = vsel %vm2958_vm7, %v2184_v8, %v1305_v51  ;;  %v1307_v17 = vrot.slane %v1305_v51, 4  ;;  %v580_v63 = vshll.u32 %v3126_v47, 16  ;;  %v584_v54 = vshrl.u32 %v3126_v47, 16  ;;  %v3183_v51 = vld [vmem:[%s2775_s30 + $0xb0] sm:$0x1] }
  0x55   : > { %v559_v61 = vsel %vm2853_vm4, %v554_v56, %v558_v20  ;;  %v564_v26 = vrot.slane %v563_v19, 4  ;;  %v573_v39 = vrot.slane %v571_v58, 4  ;;  %v576_v42 = vrot.slane %v574_v16, 5  ;;  %v3186_v16 = vld [vmem:[%s2775_s30 + $0xb4] sm:$0xf] }
  0x56   : > { %v1309_v6 = vsel %vm2958_vm7, %v1307_v17, %v1308_v60  ;;  %v582_v9 = vrot.slane %v580_v63, 5  ;;  %v586_v14 = vrot.slane %v584_v54, 4  ;;  %v590_v35 = vshll.u32 %v3134_v7, 16 }
  0x57   : > { %v569_v40 = vsel %vm2853_vm4, %v564_v26, %v568_v57  ;;  %v2203_v24 = vcombine.low %v1306_v55, %v1309_v6  ;;  %v577_v13 = vor.u32 %v576_v42, %v573_v39  ;;  %v2185_v18 = vrot.slane %v2927_v34, 9  ;;  %v3196_v6 = vld [vmem:[%s2775_s30 + $0xb8] sm:$0xf] }
  0x58   : > { %v2121_v59 = vcombine.low %v559_v61, %v569_v40  ;;  %v587_v2 = vor.u32 %v586_v14, %v582_v9  ;;  %v592_v21 = vrot.slane %v590_v35, 5  ;;  %v1312_v22 = vrot.slane %v2934_v0, 5  ;;  %v3199_v40 = vld [vmem:[%s2775_s30 + $0xbc] sm:$0x1] }
  0x59   : > { %2534 = vmatprep.mubr.msk.bf16.mxu0 %vm727_vm1, %v2203_v24  ;;  %v578_v36 = vrot.slane %v577_v13, 4  ;;  %v1315_v1 = vrot.slane %v3003_v10, 5  ;;  %v595_v33 = vshrl.u32 %v3148_v23, 16  ;;  %v598_v34 = vshll.u32 %v3148_v23, 16 }
  0x5a   : > { %2471 = vmatmul.mubr.msk.bf16.gmra.mrb[20].mxu1 %vm727_vm1, %v2121_v59  ;;  %v588_v4 = vrot.slane %v587_v2, 4  ;;  %v1313_v27 = vsel %vm2958_vm7, %v2185_v18, %v1312_v22  ;;  %v1314_v0 = vrot.slane %v1312_v22, 4  ;;  %v604_v38 = vshll.u32 %v3154_v50, 16 }
  0x5b   : > { %v583_v10 = vsel %vm2853_vm4, %v578_v36, %v582_v9  ;;  %v597_v20 = vrot.slane %v595_v33, 4  ;;  %v600_v32 = vrot.slane %v598_v34, 5  ;;  %v608_v29 = vshrl.u32 %v3154_v50, 16 }
  0x5c   : > { %v593_v52 = vsel %vm2853_vm4, %v588_v4, %v592_v21  ;;  %v1316_v3 = vsel %vm2958_vm7, %v1314_v0, %v1315_v1  ;;  %v606_v57 = vrot.slane %v604_v38, 5  ;;  %v614_v8 = vshll.u32 %v3160_v5, 16 }
  0x5d   : > { %v2122_v60 = vcombine.low %v583_v10, %v593_v52  ;;  %v2204_v56 = vcombine.low %v1313_v27, %v1316_v3  ;;  %v601_v19 = vor.u32 %v600_v32, %v597_v20  ;;  %v610_v58 = vrot.slane %v608_v29, 4 }
  0x5e   : > { %v616_v55 = vrot.slane %v614_v8, 5  ;;  %v619_v17 = vshrl.u32 %v3169_v62, 16  ;;  %v622_v63 = vshll.u32 %v3169_v62, 16  ;;  %v628_v54 = vshll.u32 %v3175_v25, 16 }
  0x5f   : > { %2474 = vmatprep.mubr.msk.bf16.mxu1 %vm727_vm1, %v2122_v60  ;;  %2535 = vmatmul.mubr.msk.bf16.gmra.mrb[12].mxu0 %vm727_vm1, %v2204_v56  ;;  %v602_v61 = vrot.slane %v601_v19, 4  ;;  %v611_v26 = vor.u32 %v610_v58, %v606_v57  ;;  %v632_v39 = vshrl.u32 %v3175_v25, 16  ;;  %v638_v42 = vshll.u32 %v3183_v51, 16 }
  0x60   : > { %v621_v9 = vrot.slane %v619_v17, 4  ;;  %v624_v14 = vrot.slane %v622_v63, 5  ;;  %v630_v35 = vrot.slane %v628_v54, 5  ;;  %v643_v24 = vshrl.u32 %v3186_v16, 16 }
  0x61   : > { %v607_v13 = vsel %vm2853_vm4, %v602_v61, %v606_v57  ;;  %v612_v18 = vrot.slane %v611_v26, 4  ;;  %v634_v59 = vrot.slane %v632_v39, 4  ;;  %v640_v2 = vrot.slane %v638_v42, 5 }
  0x62   : > { %v625_v21 = vor.u32 %v624_v14, %v621_v9  ;;  %v645_v22 = vrot.slane %v643_v24, 4  ;;  %v646_v36 = vshll.u32 %v3186_v16, 16  ;;  %v652_v1 = vshll.u32 %v3196_v6, 16 }
  0x63   : > { %v617_v33 = vsel %vm2853_vm4, %v612_v18, %v616_v55  ;;  %v635_v34 = vor.u32 %v634_v59, %v630_v35  ;;  %v656_v4 = vshrl.u32 %v3196_v6, 16  ;;  %v662_v27 = vshll.u32 %v3199_v40, 16 }
  0x64   : > { %v2123_v0 = vcombine.low %v607_v13, %v617_v33  ;;  %v626_v38 = vrot.slane %v625_v21, 4  ;;  %v648_v10 = vrot.slane %v646_v36, 5  ;;  %v654_v20 = vrot.slane %v652_v1, 5 }
  0x65   : > { %v636_v32 = vrot.slane %v635_v34, 4  ;;  %v658_v29 = vrot.slane %v656_v4, 4  ;;  %v664_v52 = vrot.slane %v662_v27, 5  ;;  %v2186_v3 = vrot.slane %v3009_v45, 9 }
  0x66   : > { %2475 = vmatmul.mubr.msk.bf16.gmra.mrb[24].mxu1 %vm727_vm1, %v2123_v0  ;;  %v631_v57 = vsel %vm2853_vm4, %v626_v38, %v630_v35  ;;  %v649_v8 = vor.u32 %v648_v10, %v645_v22  ;;  %v1319_v60 = vrot.slane %v3020_v49, 5  ;;  %v1322_v56 = vrot.slane %v3028_v53, 5 }
  0x67   : > { %v641_v19 = vsel %vm2853_vm4, %v636_v32, %v640_v2  ;;  %v659_v58 = vor.u32 %v658_v29, %v654_v20  ;;  %v2187_v55 = vrot.slane %v3041_v30, 9  ;;  %v1326_v17 = vrot.slane %v3047_v43, 5 }
  0x68   : > { %v2124_v63 = vcombine.low %v631_v57, %v641_v19  ;;  %v650_v54 = vrot.slane %v649_v8, 4  ;;  %v1320_v61 = vsel %vm2958_vm7, %v2186_v3, %v1319_v60  ;;  %v1321_v26 = vrot.slane %v1319_v60, 4 }
  0x69   : > { %v660_v39 = vrot.slane %v659_v58, 4  ;;  %v1327_v42 = vsel %vm2958_vm7, %v2187_v55, %v1326_v17  ;;  %v1328_v9 = vrot.slane %v1326_v17, 4  ;;  %v1329_v53 = vrot.slane %v3052_v11, 5 }
  0x6a   : > { %2478 = vmatprep.mubr.msk.bf16.mxu1 %vm727_vm1, %v2124_v63  ;;  %v655_v14 = vsel %vm2853_vm4, %v650_v54, %v654_v20  ;;  %v1323_v35 = vsel %vm2958_vm7, %v1321_v26, %v1322_v56  ;;  %v2152_v24 = vcombine.low %v3009_v45, %v3020_v49  ;;  %v2188_v11 = vrot.slane %v3067_v28, 9 }
  0x6b   : > { %v665_v13 = vsel %vm2853_vm4, %v660_v39, %v664_v52  ;;  %v2205_v18 = vcombine.low %v1320_v61, %v1323_v35  ;;  %v1330_v59 = vsel %vm2958_vm7, %v1328_v9, %v1329_v53  ;;  %v1333_v22 = vrot.slane %v3070_v48, 5 }
  0x6c   : > { %v2125_v2 = vcombine.low %v655_v14, %v665_v13  ;;  %v2206_v21 = vcombine.low %v1327_v42, %v1330_v59  ;;  %v1336_v36 = vrot.slane %v3079_v15, 5  ;;  %v2189_v1 = vrot.slane %v3094_v44, 9 }
  0x6d   : > { %2538 = vmatprep.mubr.msk.bf16.mxu0 %vm727_vm1, %v2205_v18  ;;  %v1340_v45 = vrot.slane %v3100_v12, 5  ;;  %v1343_v46 = vrot.slane %v3106_v31, 5  ;;  %v1334_v49 = vsel %vm2958_vm7, %v2188_v11, %v1333_v22  ;;  %v1335_v33 = vrot.slane %v1333_v22, 4 }
  0x6e   : > { %2479 = vmatmul.mubr.msk.bf16.gmra.mrb[28].mxu1 %vm727_vm1, %v2125_v2  ;;  %2539 = vmatmul.mubr.msk.bf16.gmra.mrb[16].mxu0 %vm727_vm1, %v2206_v21  ;;  %v2190_v34 = vrot.slane %v3123_v41, 9  ;;  %v1347_v27 = vrot.slane %v3126_v47, 5  ;;  %v1350_v31 = vrot.slane %v3134_v7, 5  ;;  %v1354_v38 = vrot.slane %v3154_v50, 5 }
  0x6f   : > { %2502 = vmatprep.mubr.msk.bf16.mxu1 %vm727_vm1, %v2152_v24  ;;  %v1341_v15 = vsel %vm2958_vm7, %v2189_v1, %v1340_v45  ;;  %v1342_v4 = vrot.slane %v1340_v45, 4  ;;  %v1337_v0 = vsel %vm2958_vm7, %v1335_v33, %v1336_v36  ;;  %v2153_v52 = vcombine.low %v3041_v30, %v3047_v43 }
  0x70   : > { %v2207_v10 = vcombine.low %v1334_v49, %v1337_v0  ;;  %v1348_v32 = vsel %vm2958_vm7, %v2190_v34, %v1347_v27  ;;  %v1349_v29 = vrot.slane %v1347_v27, 4  ;;  %v2154_v7 = vcombine.low %v3067_v28, %v3070_v48 }
  0x71   : > { %v1344_v20 = vsel %vm2958_vm7, %v1342_v4, %v1343_v46  ;;  %v2191_v57 = vrot.slane %v3148_v23, 9  ;;  %v1356_v60 = vrot.slane %v1354_v38, 4  ;;  %v1357_v56 = vrot.slane %v3160_v5, 5 }
  0x72   : > { %v2208_v3 = vcombine.low %v1341_v15, %v1344_v20  ;;  %2542 = vmatprep.mubr.msk.bf16.mxu0 %vm727_vm1, %v2207_v10  ;;  %v1351_v8 = vsel %vm2958_vm7, %v1349_v29, %v1350_v31  ;;  %v1361_v19 = vrot.slane %v3175_v25, 5  ;;  %v2192_v55 = vrot.slane %v3169_v62, 9 }
  0x73   : > { %v2209_v58 = vcombine.low %v1348_v32, %v1351_v8  ;;  %v1364_v30 = vrot.slane %v3183_v51, 5  ;;  %v1355_v28 = vsel %vm2958_vm7, %v2191_v57, %v1354_v38  ;;  %v1358_v48 = vsel %vm2958_vm7, %v1356_v60, %v1357_v56 }
  0x74   : > { %v1363_v43 = vrot.slane %v1361_v19, 4  ;;  %v1368_v5 = vrot.slane %v3196_v6, 5  ;;  %v1362_v51 = vsel %vm2958_vm7, %v2192_v55, %v1361_v19  ;;  %v2155_v63 = vcombine.low %v3094_v44, %v3100_v12 }
  0x75   : > { %v2210_v54 = vcombine.low %v1355_v28, %v1358_v48  ;;  %v2156_v61 = vcombine.low %v3123_v41, %v3126_v47  ;;  %v2193_v39 = vrot.slane %v3186_v16, 9  ;;  %v1371_v9 = vrot.slane %v3199_v40, 5 }
  0x76   : > { %2503 = vmatmul.mubr.msk.bf16.vlgmr.msra.gmra.mrb[16].mxu1 %vm727_vm1, %v2153_v52  ;;  %2543 = vmatmul.mubr.msk.bf16.gmra.mrb[20].mxu0 %vm727_vm1, %v2208_v3  ;;  %v1365_v17 = vsel %vm2958_vm7, %v1363_v43, %v1364_v30  ;;  %v1370_v42 = vrot.slane %v1368_v5, 4  ;;  %v2157_v41 = vcombine.low %v3148_v23, %v3154_v50  ;;  %v2158_v40 = vcombine.low %v3169_v62, %v3175_v25 }
  0x77   : > { %2506 = vmatprep.mubr.msk.bf16.mxu1 %vm727_vm1, %v2154_v7  ;;  %2546 = vmatprep.mubr.msk.bf16.mxu0 %vm727_vm1, %v2209_v58  ;;  %v2211_v26 = vcombine.low %v1362_v51, %v1365_v17  ;;  %v1369_v44 = vsel %vm2958_vm7, %v2193_v39, %v1368_v5  ;;  %v2159_v53 = vcombine.low %v3186_v16, %v3196_v6 }
  0x78   : > { %v1372_v12 = vsel %vm2958_vm7, %v1370_v42, %v1371_v9 }
  0x79   : > { %v2212_v47 = vcombine.low %v1369_v44, %v1372_v12 }
  0x7e   : > { %2507 = vmatmul.mubr.msk.bf16.gmra.mrb[20].mxu1 %vm727_vm1, %v2155_v63  ;;  %2547 = vmatmul.mubr.msk.bf16.gmra.mrb[24].mxu0 %vm727_vm1, %v2210_v54 }
  0x7f   : > { %2510 = vmatprep.mubr.msk.bf16.mxu1 %vm727_vm1, %v2156_v61  ;;  %2550 = vmatprep.mubr.msk.bf16.mxu0 %vm727_vm1, %v2211_v26 }
  0x86   : > { %2511 = vmatmul.mubr.msk.bf16.gmra.mrb[24].mxu1 %vm727_vm1, %v2157_v41  ;;  %2551 = vmatmul.mubr.msk.bf16.gmra.mrb[28].mxu0 %vm727_vm1, %v2212_v47 }
  0x87   : > { %2514 = vmatprep.mubr.msk.bf16.mxu1 %vm727_vm1, %v2158_v40 }
  0x8e   : > { %2515 = vmatmul.mubr.msk.bf16.gmra.mrb[28].mxu1 %vm727_vm1, %v2159_v53 }
  0xfa   : > { %v2452_v37 = vpop.f32.mrb[0].mxu1 }
  0xfb   : > { %v814_v14 = vpop.f32.mrb[1].mxu1 }
  0xfc   : > { %v2453_v35 = vpop.f32.mrb[2].mxu1 }
  0xfd   : > { %v817_v24 = vpop.f32.mrb[3].mxu1 }
 0x104   : > { %v2456_v23 = vpop.f32.mrb[4].mxu1 }
 0x105   : > { %v830_v50 = vpop.f32.mrb[5].mxu1 }
 0x106   : > { %v2457_v62 = vpop.f32.mrb[6].mxu1 }
 0x107   : > { %v833_v25 = vpop.f32.mrb[7].mxu1 }
 0x10b   : > { %v2524_v13 = vpop.f32.mrb[0].mxu0 }
 0x10c   : > { %v2460_v18 = vpop.f32.mrb[8].mxu1  ;;  %v3310_v59 = vadd.f32 %v2524_v13, %v2452_v37  ;;  %v1519_v11 = vpop.f32.mrb[1].mxu0 }
 0x10d   : > { %v846_v16 = vpop.f32.mrb[9].mxu1  ;;  %v3312_v6 = vadd.f32 %v1519_v11, %v814_v14  ;;  %v2525_v2 = vpop.f32.mrb[2].mxu0 }
 0x10e   : > { %v2461_v21 = vpop.f32.mrb[10].mxu1  ;;  %v3314_v22 = vadd.f32 %v2525_v2, %v2453_v35  ;;  %v1522_v36 = vpop.f32.mrb[3].mxu0 }
 0x10f   : > { %v849_v1 = vpop.f32.mrb[11].mxu1  ;;  %v3321_v45 = vadd.f32 %v1522_v36, %v817_v24 }
 0x110   : > { %v2305_v46 = vpack.c.bf16 %v3314_v22, %v3310_v59 }
 0x111   : > { %v2300_v49 = vpack.c.bf16 %v3321_v45, %v3312_v6  ;;  %v1838_v33 = vadd.f32 %v3321_v45, %v3312_v6 }
 0x112   : > { %2377 = vst [vmem:[%s3319_s10 + $0x8] sm:$0xff] %v2305_v46  }
 0x113   : > { %2301 = vst [vmem:[%s3319_s10] sm:$0xff] %v2300_v49   ;;  %v1839_v27 = vadd.f32 %v3310_v59, %v1838_v33 }
 0x115   : > { %v2464_v34 = vpop.f32.mrb[12].mxu1  ;;  %v1840_v32 = vadd.f32 %v3314_v22, %v1839_v27 }
 0x116   : > { %v862_v15 = vpop.f32.mrb[13].mxu1 }
 0x117   : > { %v2465_v4 = vpop.f32.mrb[14].mxu1 }
 0x118   : > { %v865_v31 = vpop.f32.mrb[15].mxu1 }
 0x119   : > { %v2528_v0 = vpop.f32.mrb[4].mxu0 }
 0x11a   : > { %v3332_v38 = vadd.f32 %v2528_v0, %v2456_v23  ;;  %v1535_v10 = vpop.f32.mrb[5].mxu0 }
 0x11b   : > { %v3334_v20 = vadd.f32 %v1535_v10, %v830_v50  ;;  %v2529_v29 = vpop.f32.mrb[6].mxu0 }
 0x11c   : > { %v3337_v52 = vadd.f32 %v2529_v29, %v2457_v62  ;;  %v1538_v3 = vpop.f32.mrb[7].mxu0 }
 0x11d   : > { %v3339_v7 = vadd.f32 %v1538_v3, %v833_v25  ;;  %v1841_v8 = vadd.f32 %v3334_v20, %v1840_v32 }
 0x11e   : > { %v2315_v57 = vpack.c.bf16 %v3337_v52, %v3332_v38 }
 0x11f   : > { %v2310_v60 = vpack.c.bf16 %v3339_v7, %v3334_v20  ;;  %v1842_v56 = vadd.f32 %v3339_v7, %v1841_v8 }
 0x120   : > { %2379 = vst [vmem:[%s3319_s10 + $0x18] sm:$0xff] %v2315_v57  }
 0x121   : > { %2378 = vst [vmem:[%s3319_s10 + $0x10] sm:$0xff] %v2310_v60   ;;  %v1843_v58 = vadd.f32 %v3332_v38, %v1842_v56 }
 0x123   : > { %v1844_v17 = vadd.f32 %v3337_v52, %v1843_v58 }
 0x126   : > { %v2532_v19 = vpop.f32.mrb[8].mxu0 }
 0x127   : > { %v3350_v55 = vadd.f32 %v2532_v19, %v2460_v18  ;;  %v1551_v30 = vpop.f32.mrb[9].mxu0 }
 0x128   : > { %v3352_v43 = vadd.f32 %v1551_v30, %v846_v16  ;;  %v2533_v28 = vpop.f32.mrb[10].mxu0 }
 0x129   : > { %v3354_v48 = vadd.f32 %v2533_v28, %v2461_v21  ;;  %v1554_v5 = vpop.f32.mrb[11].mxu0 }
 0x12a   : > { %v3356_v51 = vadd.f32 %v1554_v5, %v849_v1  ;;  %v1845_v61 = vadd.f32 %v3352_v43, %v1844_v17 }
 0x12b   : > { %v2325_v63 = vpack.c.bf16 %v3354_v48, %v3350_v55 }
 0x12c   : > { %v2320_v54 = vpack.c.bf16 %v3356_v51, %v3352_v43  ;;  %v1846_v39 = vadd.f32 %v3356_v51, %v1845_v61 }
 0x12d   : > { %2381 = vst [vmem:[%s3319_s10 + $0x28] sm:$0xff] %v2325_v63  }
 0x12e   : > { %2380 = vst [vmem:[%s3319_s10 + $0x20] sm:$0xff] %v2320_v54   ;;  %v1847_v53 = vadd.f32 %v3350_v55, %v1846_v39 }
 0x130   : > { %v1848_v35 = vadd.f32 %v3354_v48, %v1847_v53 }
 0x132   : > { %v2536_v26 = vpop.f32.mrb[12].mxu0 }
 0x133   : > { %v3367_v42 = vadd.f32 %v2536_v26, %v2464_v34  ;;  %v1567_v9 = vpop.f32.mrb[13].mxu0 }
 0x134   : > { %v3369_v44 = vadd.f32 %v1567_v9, %v862_v15  ;;  %v2537_v12 = vpop.f32.mrb[14].mxu0 }
 0x135   : > { %v3371_v41 = vadd.f32 %v2537_v12, %v2465_v4  ;;  %v1570_v47 = vpop.f32.mrb[15].mxu0 }
 0x136   : > { %v3373_v40 = vadd.f32 %v1570_v47, %v865_v31  ;;  %v1849_v24 = vadd.f32 %v3369_v44, %v1848_v35 }
 0x137   : > { %v2335_v37 = vpack.c.bf16 %v3371_v41, %v3367_v42 }
 0x138   : > { %v2330_v14 = vpack.c.bf16 %v3373_v40, %v3369_v44  ;;  %v1850_v62 = vadd.f32 %v3373_v40, %v1849_v24 }
 0x139   : > { %2383 = vst [vmem:[%s3319_s10 + $0x38] sm:$0xff] %v2335_v37  }
 0x13a   : > { %2382 = vst [vmem:[%s3319_s10 + $0x30] sm:$0xff] %v2330_v14   ;;  %v1851_v18 = vadd.f32 %v3367_v42, %v1850_v62 }
 0x13c   : > { %v1852_v46 = vadd.f32 %v3371_v41, %v1851_v18 }
 0x141   : > { %v2540_v23 = vpop.f32.mrb[16].mxu0 }
 0x142   : > { %v1583_v50 = vpop.f32.mrb[17].mxu0 }
 0x143   : > { %v2541_v25 = vpop.f32.mrb[18].mxu0 }
 0x144   : > { %v1586_v13 = vpop.f32.mrb[19].mxu0 }
 0x149   : > { %v2504_v11 = vpop.f32.mrb[16].mxu1  ;;  %v2544_v16 = vpop.f32.mrb[20].mxu0 }
 0x14a   : > { %v3386_v2 = vadd.f32 %v2540_v23, %v2504_v11  ;;  %v1179_v21 = vpop.f32.mrb[17].mxu1  ;;  %v1599_v36 = vpop.f32.mrb[21].mxu0 }
 0x14b   : > { %v3388_v1 = vadd.f32 %v1583_v50, %v1179_v21  ;;  %v2505_v49 = vpop.f32.mrb[18].mxu1  ;;  %v2545_v33 = vpop.f32.mrb[22].mxu0 }
 0x14c   : > { %v3391_v34 = vadd.f32 %v2541_v25, %v2505_v49  ;;  %v1182_v15 = vpop.f32.mrb[19].mxu1  ;;  %v1602_v4 = vpop.f32.mrb[23].mxu0 }
 0x14d   : > { %v1853_v27 = vadd.f32 %v3388_v1, %v1852_v46  ;;  %v3394_v31 = vadd.f32 %v1586_v13, %v1182_v15 }
 0x14e   : > { %v2345_v0 = vpack.c.bf16 %v3391_v34, %v3386_v2 }
 0x14f   : > { %v2340_v10 = vpack.c.bf16 %v3394_v31, %v3388_v1  ;;  %v1854_v32 = vadd.f32 %v3394_v31, %v1853_v27 }
 0x150   : > { %2385 = vst [vmem:[%s3319_s10 + $0x48] sm:$0xff] %v2345_v0  }
 0x151   : > { %2384 = vst [vmem:[%s3319_s10 + $0x40] sm:$0xff] %v2340_v10   ;;  %v1855_v29 = vadd.f32 %v3386_v2, %v1854_v32  ;;  %v2508_v3 = vpop.f32.mrb[20].mxu1  ;;  %v2548_v57 = vpop.f32.mrb[24].mxu0 }
 0x152   : > { %v3404_v8 = vadd.f32 %v2544_v16, %v2508_v3  ;;  %v1195_v60 = vpop.f32.mrb[21].mxu1  ;;  %v1615_v56 = vpop.f32.mrb[25].mxu0 }
 0x153   : > { %v3406_v19 = vadd.f32 %v1599_v36, %v1195_v60  ;;  %v1856_v58 = vadd.f32 %v3391_v34, %v1855_v29  ;;  %v2509_v30 = vpop.f32.mrb[22].mxu1  ;;  %v2549_v28 = vpop.f32.mrb[26].mxu0 }
 0x154   : > { %v3409_v5 = vadd.f32 %v2545_v33, %v2509_v30  ;;  %v1198_v17 = vpop.f32.mrb[23].mxu1  ;;  %v1618_v63 = vpop.f32.mrb[27].mxu0 }
 0x155   : > { %v1857_v54 = vadd.f32 %v3406_v19, %v1856_v58  ;;  %v3412_v61 = vadd.f32 %v1602_v4, %v1198_v17 }
 0x156   : > { %v2355_v26 = vpack.c.bf16 %v3409_v5, %v3404_v8 }
 0x157   : > { %v2350_v39 = vpack.c.bf16 %v3412_v61, %v3406_v19  ;;  %v1858_v9 = vadd.f32 %v3412_v61, %v1857_v54 }
 0x158   : > { %2387 = vst [vmem:[%s3319_s10 + $0x58] sm:$0xff] %v2355_v26  }
 0x159   : > { %2386 = vst [vmem:[%s3319_s10 + $0x50] sm:$0xff] %v2350_v39   ;;  %v1859_v12 = vadd.f32 %v3404_v8, %v1858_v9  ;;  %v2512_v47 = vpop.f32.mrb[24].mxu1  ;;  %v2552_v53 = vpop.f32.mrb[28].mxu0 }
 0x15a   : > { %v3422_v37 = vadd.f32 %v2548_v57, %v2512_v47  ;;  %v1211_v14 = vpop.f32.mrb[25].mxu1  ;;  %v1631_v35 = vpop.f32.mrb[29].mxu0 }
 0x15b   : > { %v3424_v24 = vadd.f32 %v1615_v56, %v1211_v14  ;;  %v1860_v23 = vadd.f32 %v3409_v5, %v1859_v12  ;;  %v2513_v50 = vpop.f32.mrb[26].mxu1  ;;  %v2553_v62 = vpop.f32.mrb[30].mxu0 }
 0x15c   : > { %v3427_v25 = vadd.f32 %v2549_v28, %v2513_v50  ;;  %v1214_v13 = vpop.f32.mrb[27].mxu1  ;;  %v1634_v18 = vpop.f32.mrb[31].mxu0 }
 0x15d   : > { %v1861_v11 = vadd.f32 %v3424_v24, %v1860_v23  ;;  %v3430_v16 = vadd.f32 %v1618_v63, %v1214_v13 }
 0x15e   : > { %v2365_v21 = vpack.c.bf16 %v3427_v25, %v3422_v37 }
 0x15f   : > { %v2360_v36 = vpack.c.bf16 %v3430_v16, %v3424_v24  ;;  %v1862_v46 = vadd.f32 %v3430_v16, %v1861_v11 }
 0x160   : > { %2389 = vst [vmem:[%s3319_s10 + $0x68] sm:$0xff] %v2365_v21  }
 0x161   : > { %2388 = vst [vmem:[%s3319_s10 + $0x60] sm:$0xff] %v2360_v36   ;;  %v1863_v49 = vadd.f32 %v3422_v37, %v1862_v46  ;;  %v2516_v33 = vpop.f32.mrb[28].mxu1 }
 0x162   : > { %v3440_v15 = vadd.f32 %v2552_v53, %v2516_v33  ;;  %v1227_v4 = vpop.f32.mrb[29].mxu1 }
 0x163   : > { %v3442_v27 = vadd.f32 %v1631_v35, %v1227_v4  ;;  %v1864_v0 = vadd.f32 %v3427_v25, %v1863_v49  ;;  %v2517_v10 = vpop.f32.mrb[30].mxu1 }
 0x164   : > { %v3445_v32 = vadd.f32 %v2553_v62, %v2517_v10  ;;  %v1230_v29 = vpop.f32.mrb[31].mxu1 }
 0x165   : > { %v1865_v3 = vadd.f32 %v3442_v27, %v1864_v0  ;;  %v3448_v57 = vadd.f32 %v1634_v18, %v1230_v29 }
 0x166   : > { %v2375_v60 = vpack.c.bf16 %v3445_v32, %v3440_v15 }
 0x167   : > { %v2370_v56 = vpack.c.bf16 %v3448_v57, %v3442_v27  ;;  %v1866_v58 = vadd.f32 %v3448_v57, %v1865_v3 }
 0x168   : > { %2391 = vst [vmem:[%s3319_s10 + $0x78] sm:$0xff] %v2375_v60  }
 0x169   : > { %2390 = vst [vmem:[%s3319_s10 + $0x70] sm:$0xff] %v2370_v56   ;;  %v1867_v30 = vadd.f32 %v3440_v15, %v1866_v58 }
 0x16b   : > { %v1868_v28 = vadd.f32 %v3445_v32, %v1867_v30 }
 0x16d   : > { %v1869_v17 = vrot.slane %v1868_v28, 4 }
 0x16f   : > { %v1870_v63 = vadd.f32 %v1869_v17, %v1868_v28 }
 0x171   : > { %v1871_v54 = vrot.slane %v1870_v63, 2 }
 0x173   : > { %v1872_v26 = vadd.f32 %v1871_v54, %v1870_v63 }
 0x175   : > { %v1873_v39 = vrot.slane %v1872_v26, 1 }
 0x177   : > { %v3459_v9 = vadd.f32 %v1873_v39, %v1872_v26 }
 0x179   : > { %v3462_v12 = vmul.f32 0.00390625, %v3459_v9 }
 0x17b   : > { %v1876_v47 = vsub.f32 %v3312_v6, %v3462_v12  ;;  %v1877_v53 = vsub.f32 %v3321_v45, %v3462_v12  ;;  %v1878_v14 = vsub.f32 %v3310_v59, %v3462_v12  ;;  %v1879_v50 = vsub.f32 %v3314_v22, %v3462_v12 }
 0x17c   : > { %v1880_v62 = vsub.f32 %v3334_v20, %v3462_v12  ;;  %v1881_v11 = vsub.f32 %v3339_v7, %v3462_v12  ;;  %v1882_v45 = vsub.f32 %v3332_v38, %v3462_v12  ;;  %v1883_v46 = vsub.f32 %v3337_v52, %v3462_v12 }
 0x17d   : > { %v1908_v35 = vmul.f32 %v1876_v47, %v1876_v47  ;;  %v1909_v23 = vmul.f32 %v1877_v53, %v1877_v53  ;;  %v1910_v13 = vmul.f32 %v1878_v14, %v1878_v14  ;;  %v1911_v6 = vmul.f32 %v1879_v50, %v1879_v50 }
 0x17e   : > { %v1912_v36 = vmul.f32 %v1880_v62, %v1880_v62  ;;  %v1913_v49 = vmul.f32 %v1881_v11, %v1881_v11  ;;  %v1884_v20 = vsub.f32 %v3352_v43, %v3462_v12  ;;  %v1914_v33 = vmul.f32 %v1882_v45, %v1882_v45 }
 0x17f   : > { %v1940_v18 = vadd.f32 %v1909_v23, %v1908_v35  ;;  %v1885_v7 = vsub.f32 %v3356_v51, %v3462_v12  ;;  %v1915_v0 = vmul.f32 %v1883_v46, %v1883_v46  ;;  %v1886_v38 = vsub.f32 %v3350_v55, %v3462_v12 }
 0x180   : > { %v1916_v29 = vmul.f32 %v1884_v20, %v1884_v20  ;;  %v1887_v52 = vsub.f32 %v3354_v48, %v3462_v12  ;;  %v1888_v43 = vsub.f32 %v3369_v44, %v3462_v12  ;;  %v1889_v51 = vsub.f32 %v3373_v40, %v3462_v12 }
 0x181   : > { %v1941_v21 = vadd.f32 %v1940_v18, %v1910_v13  ;;  %v1917_v60 = vmul.f32 %v1885_v7, %v1885_v7  ;;  %v1918_v58 = vmul.f32 %v1886_v38, %v1886_v38  ;;  %v1890_v55 = vsub.f32 %v3367_v42, %v3462_v12 }
 0x182   : > { %v1919_v28 = vmul.f32 %v1887_v52, %v1887_v52  ;;  %v1920_v63 = vmul.f32 %v1888_v43, %v1888_v43  ;;  %v1891_v48 = vsub.f32 %v3371_v41, %v3462_v12  ;;  %v1921_v26 = vmul.f32 %v1889_v51, %v1889_v51 }
 0x183   : > { %v1942_v59 = vadd.f32 %v1941_v21, %v1911_v6  ;;  %v1892_v44 = vsub.f32 %v3388_v1, %v3462_v12  ;;  %v1922_v47 = vmul.f32 %v1890_v55, %v1890_v55  ;;  %v1893_v40 = vsub.f32 %v3394_v31, %v3462_v12 }
 0x184   : > { %v1923_v14 = vmul.f32 %v1891_v48, %v1891_v48  ;;  %v1894_v42 = vsub.f32 %v3386_v2, %v3462_v12  ;;  %v1895_v41 = vsub.f32 %v3391_v34, %v3462_v12  ;;  %v1896_v1 = vsub.f32 %v3406_v19, %v3462_v12 }
 0x185   : > { %v1943_v22 = vadd.f32 %v1942_v59, %v1912_v36  ;;  %v1924_v23 = vmul.f32 %v1892_v44, %v1892_v44  ;;  %v1925_v62 = vmul.f32 %v1893_v40, %v1893_v40  ;;  %v1897_v31 = vsub.f32 %v3412_v61, %v3462_v12 }
 0x186   : > { %v1926_v18 = vmul.f32 %v1894_v42, %v1894_v42  ;;  %v1927_v6 = vmul.f32 %v1895_v41, %v1895_v41  ;;  %v1898_v2 = vsub.f32 %v3404_v8, %v3462_v12  ;;  %v1928_v45 = vmul.f32 %v1896_v1, %v1896_v1 }
 0x187   : > { %v1944_v4 = vadd.f32 %v1943_v22, %v1913_v49  ;;  %v1899_v34 = vsub.f32 %v3409_v5, %v3462_v12  ;;  %v1929_v59 = vmul.f32 %v1897_v31, %v1897_v31  ;;  %v1900_v19 = vsub.f32 %v3424_v24, %v3462_v12 }
 0x188   : > { %v1930_v49 = vmul.f32 %v1898_v2, %v1898_v2  ;;  %v1901_v61 = vsub.f32 %v3430_v16, %v3462_v12  ;;  %v1902_v8 = vsub.f32 %v3422_v37, %v3462_v12  ;;  %v1903_v5 = vsub.f32 %v3427_v25, %v3462_v12 }
 0x189   : > { %v1945_v10 = vadd.f32 %v1944_v4, %v1914_v33  ;;  %v1931_v20 = vmul.f32 %v1899_v34, %v1899_v34  ;;  %v1932_v4 = vmul.f32 %v1900_v19, %v1900_v19  ;;  %v1904_v24 = vsub.f32 %v3442_v27, %v3462_v12 }
 0x18a   : > { %v1934_v38 = vmul.f32 %v1902_v8, %v1902_v8  ;;  %v1905_v16 = vsub.f32 %v3448_v57, %v3462_v12  ;;  %v1906_v37 = vsub.f32 %v3440_v15, %v3462_v12  ;;  %v1907_v25 = vsub.f32 %v3445_v32, %v3462_v12 }
 0x18b   : > { %v1946_v3 = vadd.f32 %v1945_v10, %v1915_v0  ;;  %v1933_v0 = vmul.f32 %v1901_v61, %v1901_v61 }
 0x18c   : > { %v1937_v43 = vmul.f32 %v1905_v16, %v1905_v16  ;;  %v1939_v51 = vmul.f32 %v1907_v25, %v1907_v25 }
 0x18d   : > { %v1947_v56 = vadd.f32 %v1946_v3, %v1916_v29  ;;  %v1935_v3 = vmul.f32 %v1903_v5, %v1903_v5 }
 0x18f   : > { %v1948_v30 = vadd.f32 %v1947_v56, %v1917_v60  ;;  %v1936_v60 = vmul.f32 %v1904_v24, %v1904_v24 }
 0x191   : > { %v1949_v17 = vadd.f32 %v1948_v30, %v1918_v58  ;;  %v1938_v30 = vmul.f32 %v1906_v37, %v1906_v37 }
 0x193   : > { %v1950_v54 = vadd.f32 %v1949_v17, %v1919_v28 }
 0x195   : > { %v1951_v39 = vadd.f32 %v1950_v54, %v1920_v63 }
 0x197   : > { %v1952_v53 = vadd.f32 %v1951_v39, %v1921_v26 }
 0x199   : > { %v1953_v35 = vadd.f32 %v1952_v53, %v1922_v47 }
 0x19b   : > { %v1954_v50 = vadd.f32 %v1953_v35, %v1923_v14 }
 0x19d   : > { %v1955_v13 = vadd.f32 %v1954_v50, %v1924_v23 }
 0x19f   : > { %v1956_v11 = vadd.f32 %v1955_v13, %v1925_v62 }
 0x1a1   : > { %v1957_v21 = vadd.f32 %v1956_v11, %v1926_v18 }
 0x1a3   : > { %v1958_v36 = vadd.f32 %v1957_v21, %v1927_v6 }
 0x1a5   : > { %v1959_v46 = vadd.f32 %v1958_v36, %v1928_v45 }
 0x1a7   : > { %v1960_v22 = vadd.f32 %v1959_v46, %v1929_v59 }
 0x1a9   : > { %v1961_v33 = vadd.f32 %v1960_v22, %v1930_v49 }
 0x1ab   : > { %v1962_v7 = vadd.f32 %v1961_v33, %v1931_v20 }
 0x1ad   : > { %v1963_v10 = vadd.f32 %v1962_v7, %v1932_v4 }
 0x1af   : > { %v1964_v29 = vadd.f32 %v1963_v10, %v1933_v0 }
 0x1b1   : > { %v1965_v52 = vadd.f32 %v1964_v29, %v1934_v38 }
 0x1b3   : > { %v1966_v56 = vadd.f32 %v1965_v52, %v1935_v3 }
 0x1b5   : > { %v1967_v58 = vadd.f32 %v1966_v56, %v1936_v60 }
 0x1b7   : > { %v1968_v27 = vadd.f32 %v1967_v58, %v1937_v43 }
 0x1b9   : > { %v1969_v28 = vadd.f32 %v1968_v27, %v1938_v30 }
 0x1bb   : > { %v1970_v17 = vadd.f32 %v1969_v28, %v1939_v51 }
 0x1bd   : > { %v1971_v55 = vrot.slane %v1970_v17, 4 }
 0x1bf   : > { %v1972_v57 = vadd.f32 %v1971_v55, %v1970_v17 }
 0x1c1   : > { %v1973_v63 = vrot.slane %v1972_v57, 2 }
 0x1c3   : > { %v1974_v54 = vadd.f32 %v1973_v63, %v1972_v57 }
 0x1c5   : > { %v1975_v48 = vrot.slane %v1974_v54, 1 }
 0x1c7   : > { %v1976_v15 = vadd.f32 %v1975_v48, %v1974_v54 }
 0x1c9   : > { %v1978_v32 = vsel %vm1977_vm8, %v3459_v9, %v1976_v15 }
 0x1ca   : > { %1979 = vst [vmem:[%s226_s17] sm:$0x3] %v1978_v32 }
 0x1cb PF: > { %s14_s14 = sadd.s32 1, %s2695_s14   ;;  %s3550_s12 = smov %s2691_s13 }
 0x1cc   : > { %p11_p6 = scmp.ge.s32.totalorder %s14_s14, 4   ;;  %s3551_s13 = smov %s3553_s15 }
 0x1ce   :  { %13 = sbr.rel (!%p11_p6) target bundleno = 2 (0x2), region = 72 }

</bundles_post_ra>
